<compile_context>
chip_gen: v6e
topology: v6e:2x2x1
jax: 0.10.0
libtpu: 0.0.40
codegen_flags: <defaults>
</compile_context>

<pallas_src>
import functools
import math

import jax
import jax.numpy as jnp
from jax import lax
from jax.experimental import pallas as pl
from jax.experimental.pallas import tpu as pltpu

NUM_LAYERS = 6                           # 3 encoder + 3 decoder GNN layers
_LANE = 128                              # TPU lane width
_ADJ_RESIDENT_BYTES = 4 * 1024 * 1024    # keep adj fully VMEM-resident below this


def _round_up(v, m):
    return ((v + m - 1) // m) * m


# ----------------------------------------------------------------------------
# Kernel 1: fused 6-layer GNN stack
# ----------------------------------------------------------------------------
def _gnn_stack_kernel(x_ref, w_ref, adj_ref, zi_ref, zh_ref, feat_buf, sup_ref):
    """grid = (layer, row_block).

    Per layer l:
      Phase A (row_block == 0): support = act_l(feat_l @ W_l), held resident in
                                VMEM scratch (bf16).
      Phase B (every block):    out[rows_i] = adj[rows_i, :] @ support (f32 acc).
    feat_{l+1} ping-pongs between the two slots of `feat_buf`.  z_igae (layer 2)
    and z_hat (layer 5) are written into resident full-extent output buffers
    that are flushed to HBM once, after the last grid step.
    """
    l = pl.program_id(0)                       # layer index, 0..5
    i = pl.program_id(1)                       # adj row-block index
    tm = adj_ref.shape[0]

    # Seed the layer-0 input features once.
    @pl.when(jnp.logical_and(l == 0, i == 0))
    def _():
        feat_buf[0] = x_ref[...]

    # Phase A -- once per layer: support = act(feat @ W_l).
    @pl.when(i == 0)
    def _():
        feat = feat_buf[l % 2]                                  # (Npad, Fpad) bf16
        s = jnp.dot(feat, w_ref[0], preferred_element_type=jnp.float32)
        # LeakyReLU(0.2) everywhere except encoder gnn_3 (layer 2, active=False).
        slope = jnp.where(l == 2, 1.0, 0.2)
        s = jnp.where(s > 0.0, s, slope * s)
        sup_ref[...] = s.astype(sup_ref.dtype)

    # Phase B -- every row block: out = adj_rows @ support (bf16 MXU, f32 acc).
    out = jnp.dot(adj_ref[...], sup_ref[...], preferred_element_type=jnp.float32)
    row0 = pl.multiple_of(i * tm, tm)
    out_b = out.astype(feat_buf.dtype)

    # Next-layer features go to the other ping-pong slot (static slot index via
    # pl.when; the store only uses a sublane-aligned dynamic slice).
    @pl.when(l % 2 == 0)
    def _():
        feat_buf[1, pl.ds(row0, tm), :] = out_b

    @pl.when(l % 2 == 1)
    def _():
        feat_buf[0, pl.ds(row0, tm), :] = out_b

    @pl.when(l == 2)                            # z_igae = encoder output (f32)
    def _():
        zi_ref[pl.ds(row0, tm), :] = out

    @pl.when(l == NUM_LAYERS - 1)               # z_hat = decoder output (f32)
    def _():
        zh_ref[pl.ds(row0, tm), :] = out


def _gnn_stack(x_pad, w_all, adj_pad, *, tm):
    npad, fpad = x_pad.shape
    assert npad % tm == 0
    flops = NUM_LAYERS * (2 * npad * fpad * fpad + 2 * npad * npad * fpad)
    bytes_accessed = (NUM_LAYERS * npad * npad * 2      # adj (bf16), re-read per layer
                      + npad * fpad * 2                 # x
                      + NUM_LAYERS * fpad * fpad * 2    # weights
                      + 2 * npad * fpad * 4)            # z_igae, z_hat
    return pl.pallas_call(
        _gnn_stack_kernel,
        out_shape=(jax.ShapeDtypeStruct((npad, fpad), jnp.float32),
                   jax.ShapeDtypeStruct((npad, fpad), jnp.float32)),
        grid_spec=pltpu.PrefetchScalarGridSpec(
            num_scalar_prefetch=0,
            grid=(NUM_LAYERS, npad // tm),
            in_specs=[
                pl.BlockSpec((npad, fpad), lambda l, i: (0, 0)),        # x (resident)
                pl.BlockSpec((1, fpad, fpad), lambda l, i: (l, 0, 0)),  # W_l
                pl.BlockSpec((tm, npad), lambda l, i: (i, 0)),          # adj row block
            ],
            out_specs=(
                pl.BlockSpec((npad, fpad), lambda l, i: (0, 0)),        # z_igae (resident)
                pl.BlockSpec((npad, fpad), lambda l, i: (0, 0)),        # z_hat  (resident)
            ),
            scratch_shapes=[
                pltpu.VMEM((2, npad, fpad), jnp.bfloat16),   # feature ping-pong
                pltpu.VMEM((npad, fpad), jnp.bfloat16),      # current-layer support
            ],
        ),
        compiler_params=pltpu.CompilerParams(
            # Both axes carry dependencies through the VMEM feature scratch
            # (layer l+1 needs every row block of layer l) -> "arbitrary".
            dimension_semantics=("arbitrary", "arbitrary")),
        cost_estimate=pl.CostEstimate(flops=flops, transcendentals=0,
                                      bytes_accessed=bytes_accessed),
    )(x_pad, w_all, adj_pad)


# ----------------------------------------------------------------------------
# Kernel 2: adj_hat = sigmoid(z_igae @ z_igae.T) + sigmoid(z_hat @ z_hat.T)
# ----------------------------------------------------------------------------
def _adj_hat_kernel(zi_i_ref, zi_j_ref, zh_i_ref, zh_j_ref, out_ref):
    dn = (((1,), (1,)), ((), ()))              # contract last dim of both (z @ z.T)
    zi_i = zi_i_ref[...].astype(jnp.bfloat16)
    zi_j = zi_j_ref[...].astype(jnp.bfloat16)
    zh_i = zh_i_ref[...].astype(jnp.bfloat16)
    zh_j = zh_j_ref[...].astype(jnp.bfloat16)
    a1 = lax.dot_general(zi_i, zi_j, dn, preferred_element_type=jnp.float32)
    a2 = lax.dot_general(zh_i, zh_j, dn, preferred_element_type=jnp.float32)
    out_ref[...] = jax.nn.sigmoid(a1) + jax.nn.sigmoid(a2)


def _adj_hat(zi_pad, zh_pad, *, tm, tn):
    npad, fpad = zi_pad.shape
    assert npad % tm == 0 and npad % tn == 0
    flops = 2 * (2 * npad * npad * fpad)
    bytes_accessed = npad * npad * 4 + 2 * (npad // tn) * npad * fpad * 4
    return pl.pallas_call(
        _adj_hat_kernel,
        out_shape=jax.ShapeDtypeStruct((npad, npad), jnp.float32),
        grid_spec=pltpu.PrefetchScalarGridSpec(
            num_scalar_prefetch=0,
            grid=(npad // tm, npad // tn),
            in_specs=[
                pl.BlockSpec((tm, fpad), lambda i, j: (i, 0)),   # z_igae rows i
                pl.BlockSpec((tn, fpad), lambda i, j: (j, 0)),   # z_igae rows j
                pl.BlockSpec((tm, fpad), lambda i, j: (i, 0)),   # z_hat rows i
                pl.BlockSpec((tn, fpad), lambda i, j: (j, 0)),   # z_hat rows j
            ],
            out_specs=pl.BlockSpec((tm, tn), lambda i, j: (i, j)),
        ),
        compiler_params=pltpu.CompilerParams(
            dimension_semantics=("parallel", "parallel")),
        cost_estimate=pl.CostEstimate(flops=flops,
                                      transcendentals=2 * npad * npad,
                                      bytes_accessed=bytes_accessed),
    )(zi_pad, zi_pad, zh_pad, zh_pad)


# ----------------------------------------------------------------------------
# IGAE forward
# ----------------------------------------------------------------------------
@functools.partial(jax.jit, static_argnames=("tm", "tn"))
def igae_forward(x, adj, weights, *, tm=None, tn=128):
    """IGAE.forward -> (z_igae, z_hat, adj_hat).

    `weights` = [W1..W6], each [in_features, out_features] like GNNLayer.weight.
    """
    n, n_in = x.shape
    assert adj.shape == (n, n)
    assert len(weights) == NUM_LAYERS
    f_in = n_in
    for w in weights:                      # validates the chain (gae_n_dec_1 == gae_n_enc_3, ...)
        assert w.shape[0] == f_in, "layer width chain mismatch"
        f_in = w.shape[1]
    assert f_in == n_in, "decoder must map back to n_input"

    fpad = _round_up(max([n_in] + [d for w in weights for d in w.shape]), _LANE)
    npad = _round_up(n, _LANE)
    if tm is None:
        # Small graphs: one full-extent adj block => adj is DMA'd once and
        # reused by all 6 layers.  Large graphs: 128-row blocks so VMEM usage
        # is independent of N (v7x: 64 MiB VMEM, 32 MiB scoped default).
        tm = npad if npad * npad * 2 <= _ADJ_RESIDENT_BYTES else 128
    npad = _round_up(npad, max(tm, tn))

    bf16 = jnp.bfloat16
    x_pad = jnp.zeros((npad, fpad), bf16).at[:n, :n_in].set(x.astype(bf16))
    adj_pad = jnp.zeros((npad, npad), bf16).at[:n, :n].set(adj.astype(bf16))
    w_all = jnp.stack([
        jnp.zeros((fpad, fpad), bf16).at[:w.shape[0], :w.shape[1]].set(w.astype(bf16))
        for w in weights])

    zi_pad, zh_pad = _gnn_stack(x_pad, w_all, adj_pad, tm=tm)
    ah_pad = _adj_hat(zi_pad, zh_pad, tm=tn, tn=tn)

    e3 = weights[2].shape[1]
    return zi_pad[:n, :e3], zh_pad[:n, :n_in], ah_pad[:n, :n]


# ----------------------------------------------------------------------------
# Pure-JAX reference.  It emulates the kernel's operand precision exactly (all
# matmul operands rounded to bf16, f32 accumulation), so the comparison below
# checks the tiling / layer-chaining / padding logic rather than bf16 rounding.
# ----------------------------------------------------------------------------
def igae_reference(x, adj, weights):
    q = lambda a: a.astype(jnp.bfloat16).astype(jnp.float32)
    adj_q = q(adj)
    feat = q(x)
    outs = []
    for idx, w in enumerate(weights):
        s = feat @ q(w)
        if idx != 2:                       # encoder gnn_3 runs with active=False
            s = jnp.where(s > 0.0, s, 0.2 * s)
        out = adj_q @ q(s)                 # f32 result of this GNN layer
        outs.append(out)
        feat = q(out)                      # next layer consumes the bf16 copy
    z_igae, z_hat = outs[2], outs[5]
    zi, zh = q(z_igae), q(z_hat)
    adj_hat = jax.nn.sigmoid(zi @ zi.T) + jax.nn.sigmoid(zh @ zh.T)
    return z_igae, z_hat, adj_hat


def xavier_uniform(key, fan_in, fan_out):
    bound = math.sqrt(6.0 / (fan_in + fan_out))
    return jax.random.uniform(key, (fan_in, fan_out), jnp.float32, -bound, bound)


if __name__ == "__main__":
    # Small synthetic graph (N deliberately not a multiple of 128 to exercise
    # the padding path): N=200 nodes, n_input=16 features.
    N = 200
    n_input = 16
    e1, e2, e3 = 32, 16, 8            # gae_n_enc_1..3
    d1, d2, d3 = e3, 16, 32           # gae_n_dec_1..3 (d1 must equal e3)

    key = jax.random.PRNGKey(0)
    k_x, k_adj, *k_w = jax.random.split(key, 8)

    x = jax.random.normal(k_x, (N, n_input), jnp.float32)
    a = (jax.random.uniform(k_adj, (N, N)) < 0.2).astype(jnp.float32)
    a = a + jnp.eye(N, dtype=jnp.float32)
    adj = a / jnp.sum(a, axis=1, keepdims=True)     # row-normalized, self-loops

    widths = [(n_input, e1), (e1, e2), (e2, e3), (d1, d2), (d2, d3), (d3, n_input)]
    weights = [xavier_uniform(k, fi, fo) for k, (fi, fo) in zip(k_w, widths)]

    zr, hr, ar = igae_reference(x, adj, weights)

    # 1) auto tiling (adj small enough -> fully VMEM-resident, fetched once).
    z_igae, z_hat, adj_hat = igae_forward(x, adj, weights)
    jax.block_until_ready((z_igae, z_hat, adj_hat))
    assert z_igae.shape == (N, e3) and z_hat.shape == (N, n_input) and adj_hat.shape == (N, N)
    assert jnp.allclose(z_igae, zr, rtol=5e-3, atol=5e-4)
    assert jnp.allclose(z_hat, hr, rtol=5e-3, atol=5e-4)
    assert jnp.allclose(adj_hat, ar, rtol=5e-3, atol=5e-4)

    # 2) forced 128-row adj blocks (the path used for large graphs on v7x).
    z_igae2, z_hat2, adj_hat2 = igae_forward(x, adj, weights, tm=128, tn=128)
    jax.block_until_ready((z_igae2, z_hat2, adj_hat2))
    assert jnp.allclose(z_igae2, zr, rtol=5e-3, atol=5e-4)
    assert jnp.allclose(z_hat2, hr, rtol=5e-3, atol=5e-4)
    assert jnp.allclose(adj_hat2, ar, rtol=5e-3, atol=5e-4)

    print("KERNEL_OK")
</pallas_src>

<mosaic_0001>
module attributes {stable_mosaic.version = 11 : i64} {
  func.func @_gnn_stack_kernel(%arg0: i32, %arg1: i32, %arg2: memref<256x128xbf16, #tpu.memory_space<vmem>>, %arg3: memref<1x128x128xbf16, #tpu.memory_space<vmem>>, %arg4: memref<256x256xbf16, #tpu.memory_space<vmem>>, %arg5: memref<256x128xf32, #tpu.memory_space<vmem>>, %arg6: memref<256x128xf32, #tpu.memory_space<vmem>>, %arg7: memref<2x256x128xbf16, #tpu.memory_space<vmem>>, %arg8: memref<256x128xbf16, #tpu.memory_space<vmem>>) attributes {dimension_semantics = [#tpu.dimension_semantics<arbitrary>, #tpu.dimension_semantics<arbitrary>], iteration_bounds = array<i64: 6, 1>, scalar_prefetch = 0 : i64, scratch_operands = 2 : i64, tpu.core_type = #tpu.core_type<tc>, window_params = [{pipeline_mode = #tpu.pipeline_mode<synchronous>, transform_indices = @transform_0, window_bounds = array<i64: 256, 128>}, {transform_indices = @transform_1, window_bounds = array<i64: 1, 128, 128>}, {transform_indices = @transform_2, window_bounds = array<i64: 256, 256>}, {pipeline_mode = #tpu.pipeline_mode<synchronous>, transform_indices = @transform_3, window_bounds = array<i64: 256, 128>}, {pipeline_mode = #tpu.pipeline_mode<synchronous>, transform_indices = @transform_4, window_bounds = array<i64: 256, 128>}]} {
    %c0_i32 = arith.constant 0 : i32
    %0 = arith.cmpi eq, %arg0, %c0_i32 : i32
    %c0_i32_0 = arith.constant 0 : i32
    %1 = arith.cmpi eq, %arg1, %c0_i32_0 : i32
    %2 = arith.andi %0, %1 : i1
    %3 = arith.extui %2 : i1 to i32
    %c0_i32_1 = arith.constant 0 : i32
    %4 = arith.cmpi ne, %3, %c0_i32_1 : i32
    scf.if %4 {
      %c0_24 = arith.constant 0 : index
      %c0_25 = arith.constant 0 : index
      %46 = vector.load %arg2[%c0_24, %c0_25] : memref<256x128xbf16, #tpu.memory_space<vmem>>, vector<256x128xbf16>
      %c0_26 = arith.constant 0 : index
      %c0_27 = arith.constant 0 : index
      %c0_28 = arith.constant 0 : index
      %47 = vector.load %arg7[%c0_26, %c0_27, %c0_28] : memref<2x256x128xbf16, #tpu.memory_space<vmem>>, vector<1x256x128xbf16>
      %48 = vector.shape_cast %47 : vector<1x256x128xbf16> to vector<256x128xbf16>
      %49 = vector.shape_cast %46 : vector<256x128xbf16> to vector<1x256x128xbf16>
      tpu.vector_store %arg7[%c0_26, %c0_27, %c0_28], %49 {strides = array<i32>} : memref<2x256x128xbf16, #tpu.memory_space<vmem>>, vector<1x256x128xbf16>,
    } else {
    }
    %c0_i32_2 = arith.constant 0 : i32
    %5 = arith.cmpi eq, %arg1, %c0_i32_2 : i32
    %6 = arith.extui %5 : i1 to i32
    %c0_i32_3 = arith.constant 0 : i32
    %7 = arith.cmpi ne, %6, %c0_i32_3 : i32
    scf.if %7 {
      %c2_i32_24 = arith.constant 2 : i32
      %c0_i32_25 = arith.constant 0 : i32
      %46 = arith.cmpi eq, %c2_i32_24, %c0_i32_25 : i32
      %c1_i32_26 = arith.constant 1 : i32
      %47 = arith.select %46, %c1_i32_26, %c2_i32_24 : i32
      %48 = arith.remsi %arg0, %47 : i32
      %c0_i32_27 = arith.constant 0 : i32
      %49 = arith.cmpi ne, %48, %c0_i32_27 : i32
      %c0_i32_28 = arith.constant 0 : i32
      %50 = arith.cmpi slt, %48, %c0_i32_28 : i32
      %c0_i32_29 = arith.constant 0 : i32
      %51 = arith.cmpi slt, %47, %c0_i32_29 : i32
      %52 = arith.xori %50, %51 : i1
      %53 = arith.andi %52, %49 : i1
      %54 = arith.addi %48, %47 : i32
      %55 = arith.select %53, %54, %48 : i32
      %56 = arith.index_cast %55 : i32 to index
      %c0_30 = arith.constant 0 : index
      %c0_31 = arith.constant 0 : index
      %57 = vector.load %arg7[%56, %c0_30, %c0_31] : memref<2x256x128xbf16, #tpu.memory_space<vmem>>, vector<1x256x128xbf16>
      %58 = vector.shape_cast %57 : vector<1x256x128xbf16> to vector<256x128xbf16>
      %c0_32 = arith.constant 0 : index
      %c0_33 = arith.constant 0 : index
      %c0_34 = arith.constant 0 : index
      %59 = vector.load %arg3[%c0_32, %c0_33, %c0_34] : memref<1x128x128xbf16, #tpu.memory_space<vmem>>, vector<1x128x128xbf16>
      %60 = vector.shape_cast %59 : vector<1x128x128xbf16> to vector<128x128xbf16>
      %cst_35 = arith.constant dense<0.000000e+00> : vector<256x128xf32>
      %61 = tpu.matmul %58, %60, %cst_35 {dimension_numbers = #tpu.dot_dimension_numbers<[1], [0], [0], [1], [0, 0, 1, 1], [], []>} : vector<256x128xbf16>, vector<128x128xbf16>, vector<256x128xf32> -> vector<256x128xf32>
      %c2_i32_36 = arith.constant 2 : i32
      %62 = arith.cmpi eq, %arg0, %c2_i32_36 : i32
      %cst_37 = arith.constant 1.000000e+00 : f32
      %cst_38 = arith.constant 2.000000e-01 : f32
      %63 = arith.select %62, %cst_37, %cst_38 : f32
      %cst_39 = arith.constant 0.000000e+00 : f32
      %64 = vector.broadcast %cst_39 : f32 to vector<256x128xf32>
      %65 = arith.cmpf ogt, %61, %64 : vector<256x128xf32>
      %66 = vector.broadcast %63 : f32 to vector<256x128xf32>
      %67 = arith.mulf %66, %61 : vector<256x128xf32>
      %68 = arith.select %65, %61, %67 : vector<256x128xi1>, vector<256x128xf32>
      %69 = arith.truncf %68 : vector<256x128xf32> to vector<256x128xbf16>
      %c0_40 = arith.constant 0 : index
      %c0_41 = arith.constant 0 : index
      %70 = vector.load %arg8[%c0_40, %c0_41] : memref<256x128xbf16, #tpu.memory_space<vmem>>, vector<256x128xbf16>
      tpu.vector_store %arg8[%c0_40, %c0_41], %69 {strides = array<i32>} : memref<256x128xbf16, #tpu.memory_space<vmem>>, vector<256x128xbf16>,
    } else {
    }
    %c0 = arith.constant 0 : index
    %c0_4 = arith.constant 0 : index
    %8 = vector.load %arg4[%c0, %c0_4] : memref<256x256xbf16, #tpu.memory_space<vmem>>, vector<256x256xbf16>
    %c0_5 = arith.constant 0 : index
    %c0_6 = arith.constant 0 : index
    %9 = vector.load %arg8[%c0_5, %c0_6] : memref<256x128xbf16, #tpu.memory_space<vmem>>, vector<256x128xbf16>
    %cst = arith.constant dense<0.000000e+00> : vector<256x128xf32>
    %10 = tpu.matmul %8, %9, %cst {dimension_numbers = #tpu.dot_dimension_numbers<[1], [0], [0], [1], [0, 0, 1, 1], [], []>} : vector<256x256xbf16>, vector<256x128xbf16>, vector<256x128xf32> -> vector<256x128xf32>
    %c256_i32 = arith.constant 256 : i32
    %11 = arith.muli %arg1, %c256_i32 : i32
    %12 = tpu.assume_multiple %11, 256 : i32
    %13 = arith.truncf %10 : vector<256x128xf32> to vector<256x128xbf16>
    %c2_i32 = arith.constant 2 : i32
    %c0_i32_7 = arith.constant 0 : i32
    %14 = arith.cmpi eq, %c2_i32, %c0_i32_7 : i32
    %c1_i32 = arith.constant 1 : i32
    %15 = arith.select %14, %c1_i32, %c2_i32 : i32
    %16 = arith.remsi %arg0, %15 : i32
    %c0_i32_8 = arith.constant 0 : i32
    %17 = arith.cmpi ne, %16, %c0_i32_8 : i32
    %c0_i32_9 = arith.constant 0 : i32
    %18 = arith.cmpi slt, %16, %c0_i32_9 : i32
    %c0_i32_10 = arith.constant 0 : i32
    %19 = arith.cmpi slt, %15, %c0_i32_10 : i32
    %20 = arith.xori %18, %19 : i1
    %21 = arith.andi %20, %17 : i1
    %22 = arith.addi %16, %15 : i32
    %23 = arith.select %21, %22, %16 : i32
    %c0_i32_11 = arith.constant 0 : i32
    %24 = arith.cmpi eq, %23, %c0_i32_11 : i32
    %25 = arith.extui %24 : i1 to i32
    %c0_i32_12 = arith.constant 0 : i32
    %26 = arith.cmpi ne, %25, %c0_i32_12 : i32
    scf.if %26 {
      %c1 = arith.constant 1 : index
      %46 = arith.index_cast %12 : i32 to index
      %c0_24 = arith.constant 0 : index
      %47 = vector.load %arg7[%c1, %46, %c0_24] : memref<2x256x128xbf16, #tpu.memory_space<vmem>>, vector<1x256x128xbf16>
      %48 = vector.shape_cast %47 : vector<1x256x128xbf16> to vector<256x128xbf16>
      %49 = vector.shape_cast %13 : vector<256x128xbf16> to vector<1x256x128xbf16>
      tpu.vector_store %arg7[%c1, %46, %c0_24], %49 {strides = array<i32>} : memref<2x256x128xbf16, #tpu.memory_space<vmem>>, vector<1x256x128xbf16>,
    } else {
    }
    %c2_i32_13 = arith.constant 2 : i32
    %c0_i32_14 = arith.constant 0 : i32
    %27 = arith.cmpi eq, %c2_i32_13, %c0_i32_14 : i32
    %c1_i32_15 = arith.constant 1 : i32
    %28 = arith.select %27, %c1_i32_15, %c2_i32_13 : i32
    %29 = arith.remsi %arg0, %28 : i32
    %c0_i32_16 = arith.constant 0 : i32
    %30 = arith.cmpi ne, %29, %c0_i32_16 : i32
    %c0_i32_17 = arith.constant 0 : i32
    %31 = arith.cmpi slt, %29, %c0_i32_17 : i32
    %c0_i32_18 = arith.constant 0 : i32
    %32 = arith.cmpi slt, %28, %c0_i32_18 : i32
    %33 = arith.xori %31, %32 : i1
    %34 = arith.andi %33, %30 : i1
    %35 = arith.addi %29, %28 : i32
    %36 = arith.select %34, %35, %29 : i32
    %c1_i32_19 = arith.constant 1 : i32
    %37 = arith.cmpi eq, %36, %c1_i32_19 : i32
    %38 = arith.extui %37 : i1 to i32
    %c0_i32_20 = arith.constant 0 : i32
    %39 = arith.cmpi ne, %38, %c0_i32_20 : i32
    scf.if %39 {
      %c0_24 = arith.constant 0 : index
      %46 = arith.index_cast %12 : i32 to index
      %c0_25 = arith.constant 0 : index
      %47 = vector.load %arg7[%c0_24, %46, %c0_25] : memref<2x256x128xbf16, #tpu.memory_space<vmem>>, vector<1x256x128xbf16>
      %48 = vector.shape_cast %47 : vector<1x256x128xbf16> to vector<256x128xbf16>
      %49 = vector.shape_cast %13 : vector<256x128xbf16> to vector<1x256x128xbf16>
      tpu.vector_store %arg7[%c0_24, %46, %c0_25], %49 {strides = array<i32>} : memref<2x256x128xbf16, #tpu.memory_space<vmem>>, vector<1x256x128xbf16>,
    } else {
    }
    %c2_i32_21 = arith.constant 2 : i32
    %40 = arith.cmpi eq, %arg0, %c2_i32_21 : i32
    %41 = arith.extui %40 : i1 to i32
    %c0_i32_22 = arith.constant 0 : i32
    %42 = arith.cmpi ne, %41, %c0_i32_22 : i32
    scf.if %42 {
      %46 = arith.index_cast %12 : i32 to index
      %c0_24 = arith.constant 0 : index
      %47 = vector.load %arg5[%46, %c0_24] : memref<256x128xf32, #tpu.memory_space<vmem>>, vector<256x128xf32>
      tpu.vector_store %arg5[%46, %c0_24], %10 {strides = array<i32>} : memref<256x128xf32, #tpu.memory_space<vmem>>, vector<256x128xf32>,
    } else {
    }
    %c5_i32 = arith.constant 5 : i32
    %43 = arith.cmpi eq, %arg0, %c5_i32 : i32
    %44 = arith.extui %43 : i1 to i32
    %c0_i32_23 = arith.constant 0 : i32
    %45 = arith.cmpi ne, %44, %c0_i32_23 : i32
    scf.if %45 {
      %46 = arith.index_cast %12 : i32 to index
      %c0_24 = arith.constant 0 : index
      %47 = vector.load %arg6[%46, %c0_24] : memref<256x128xf32, #tpu.memory_space<vmem>>, vector<256x128xf32>
      tpu.vector_store %arg6[%46, %c0_24], %10 {strides = array<i32>} : memref<256x128xf32, #tpu.memory_space<vmem>>, vector<256x128xf32>,
    } else {
    }
    return
  }
  func.func @transform_0(%arg0: i32, %arg1: i32) -> (i32, i32) {
    %c0_i32 = arith.constant 0 : i32
    %c0_i32_0 = arith.constant 0 : i32
    %c0_i32_1 = arith.constant 0 : i32
    return %c0_i32, %c0_i32_0 : i32, i32
  }
  func.func @transform_1(%arg0: i32, %arg1: i32) -> (i32, i32, i32) {
    %c0_i32 = arith.constant 0 : i32
    %c0_i32_0 = arith.constant 0 : i32
    %c0_i32_1 = arith.constant 0 : i32
    return %arg0, %c0_i32, %c0_i32_0 : i32, i32, i32
  }
  func.func @transform_2(%arg0: i32, %arg1: i32) -> (i32, i32) {
    %c0_i32 = arith.constant 0 : i32
    %c0_i32_0 = arith.constant 0 : i32
    return %arg1, %c0_i32 : i32, i32
  }
  func.func @transform_3(%arg0: i32, %arg1: i32) -> (i32, i32) {
    %c0_i32 = arith.constant 0 : i32
    %c0_i32_0 = arith.constant 0 : i32
    %c0_i32_1 = arith.constant 0 : i32
    return %c0_i32, %c0_i32_0 : i32, i32
  }
  func.func @transform_4(%arg0: i32, %arg1: i32) -> (i32, i32) {
    %c0_i32 = arith.constant 0 : i32
    %c0_i32_0 = arith.constant 0 : i32
    %c0_i32_1 = arith.constant 0 : i32
    return %c0_i32, %c0_i32_0 : i32, i32
  }
}

module attributes {stable_mosaic.version = 11 : i64} {
  func.func @_adj_hat_kernel(%arg0: i32, %arg1: i32, %arg2: memref<128x128xf32, #tpu.memory_space<vmem>>, %arg3: memref<128x128xf32, #tpu.memory_space<vmem>>, %arg4: memref<128x128xf32, #tpu.memory_space<vmem>>, %arg5: memref<128x128xf32, #tpu.memory_space<vmem>>, %arg6: memref<128x128xf32, #tpu.memory_space<vmem>>) attributes {dimension_semantics = [#tpu.dimension_semantics<parallel>, #tpu.dimension_semantics<parallel>], iteration_bounds = array<i64: 2, 2>, scalar_prefetch = 0 : i64, scratch_operands = 0 : i64, tpu.core_type = #tpu.core_type<tc>, window_params = [{transform_indices = @transform_0, window_bounds = array<i64: 128, 128>}, {transform_indices = @transform_1, window_bounds = array<i64: 128, 128>}, {transform_indices = @transform_2, window_bounds = array<i64: 128, 128>}, {transform_indices = @transform_3, window_bounds = array<i64: 128, 128>}, {transform_indices = @transform_4, window_bounds = array<i64: 128, 128>}]} {
    %c0 = arith.constant 0 : index
    %c0_0 = arith.constant 0 : index
    %0 = vector.load %arg2[%c0, %c0_0] : memref<128x128xf32, #tpu.memory_space<vmem>>, vector<128x128xf32>
    %1 = arith.truncf %0 : vector<128x128xf32> to vector<128x128xbf16>
    %c0_1 = arith.constant 0 : index
    %c0_2 = arith.constant 0 : index
    %2 = vector.load %arg3[%c0_1, %c0_2] : memref<128x128xf32, #tpu.memory_space<vmem>>, vector<128x128xf32>
    %3 = arith.truncf %2 : vector<128x128xf32> to vector<128x128xbf16>
    %c0_3 = arith.constant 0 : index
    %c0_4 = arith.constant 0 : index
    %4 = vector.load %arg4[%c0_3, %c0_4] : memref<128x128xf32, #tpu.memory_space<vmem>>, vector<128x128xf32>
    %5 = arith.truncf %4 : vector<128x128xf32> to vector<128x128xbf16>
    %c0_5 = arith.constant 0 : index
    %c0_6 = arith.constant 0 : index
    %6 = vector.load %arg5[%c0_5, %c0_6] : memref<128x128xf32, #tpu.memory_space<vmem>>, vector<128x128xf32>
    %7 = arith.truncf %6 : vector<128x128xf32> to vector<128x128xbf16>
    %cst = arith.constant dense<0.000000e+00> : vector<128x128xf32>
    %8 = tpu.matmul %1, %3, %cst {dimension_numbers = #tpu.dot_dimension_numbers<[1], [1], [0], [0], [0, 0, 1, 0], [], []>} : vector<128x128xbf16>, vector<128x128xbf16>, vector<128x128xf32> -> vector<128x128xf32>
    %cst_7 = arith.constant dense<0.000000e+00> : vector<128x128xf32>
    %9 = tpu.matmul %5, %7, %cst_7 {dimension_numbers = #tpu.dot_dimension_numbers<[1], [1], [0], [0], [0, 0, 1, 0], [], []>} : vector<128x128xbf16>, vector<128x128xbf16>, vector<128x128xf32> -> vector<128x128xf32>
    %10 = arith.negf %8 : vector<128x128xf32>
    %11 = math.exp %10 : vector<128x128xf32>
    %cst_8 = arith.constant 1.000000e+00 : f32
    %12 = vector.broadcast %cst_8 : f32 to vector<128x128xf32>
    %13 = arith.addf %12, %11 : vector<128x128xf32>
    %14 = arith.divf %12, %13 : vector<128x128xf32>
    %15 = arith.negf %9 : vector<128x128xf32>
    %16 = math.exp %15 : vector<128x128xf32>
    %cst_9 = arith.constant 1.000000e+00 : f32
    %17 = vector.broadcast %cst_9 : f32 to vector<128x128xf32>
    %18 = arith.addf %17, %16 : vector<128x128xf32>
    %19 = arith.divf %17, %18 : vector<128x128xf32>
    %20 = arith.addf %14, %19 : vector<128x128xf32>
    %c0_10 = arith.constant 0 : index
    %c0_11 = arith.constant 0 : index
    %21 = vector.load %arg6[%c0_10, %c0_11] : memref<128x128xf32, #tpu.memory_space<vmem>>, vector<128x128xf32>
    tpu.vector_store %arg6[%c0_10, %c0_11], %20 {strides = array<i32>} : memref<128x128xf32, #tpu.memory_space<vmem>>, vector<128x128xf32>,
    return
  }
  func.func @transform_0(%arg0: i32, %arg1: i32) -> (i32, i32) {
    %c0_i32 = arith.constant 0 : i32
    %c0_i32_0 = arith.constant 0 : i32
    return %arg0, %c0_i32 : i32, i32
  }
  func.func @transform_1(%arg0: i32, %arg1: i32) -> (i32, i32) {
    %c0_i32 = arith.constant 0 : i32
    %c0_i32_0 = arith.constant 0 : i32
    return %arg1, %c0_i32 : i32, i32
  }
  func.func @transform_2(%arg0: i32, %arg1: i32) -> (i32, i32) {
    %c0_i32 = arith.constant 0 : i32
    %c0_i32_0 = arith.constant 0 : i32
    return %arg0, %c0_i32 : i32, i32
  }
  func.func @transform_3(%arg0: i32, %arg1: i32) -> (i32, i32) {
    %c0_i32 = arith.constant 0 : i32
    %c0_i32_0 = arith.constant 0 : i32
    return %arg1, %c0_i32 : i32, i32
  }
  func.func @transform_4(%arg0: i32, %arg1: i32) -> (i32, i32) {
    %c0_i32 = arith.constant 0 : i32
    return %arg0, %arg1 : i32, i32
  }
}

</mosaic_0001>

<bundles_post_ra>
// kernel: igae_forward.3
= control target key start
LH: loop header
LB: loop body
LE: loop exit
PB: predicated region body
PF: predicated region fallthrough
CT: control target
= control target key end

     0   :  { %s1409_s15 = smov 0   ;;  %s1411_s16 = smov 0   ;;  %s1617_s0 = inlined_call_operand.vmem [shape: f32[256,128], index: 0, kind: input, shape index: {}, may-alias: {0,1}]   ;;  %s1618_s1 = inlined_call_operand.vmem [shape: f32[256,128], index: 1, kind: input, shape index: {}, may-alias: {0,1}]   ;;  %s1619_s2 = inlined_call_operand.vmem [shape: f32[256,128], index: 2, kind: input, shape index: {}, may-alias: {2,3}]   ;;  %s1620_s3 = inlined_call_operand.vmem [shape: f32[256,128], index: 3, kind: input, shape index: {}, may-alias: {2,3}]   ;;  %s1621_s4 = inlined_call_operand.vmem [shape: f32[256,256], index: 4, kind: output, shape index: {}]  }
   0x1   :  { %s1413_s17 = smov 0   ;;  %s1415_s18 = smov 0  }
   0x2   :  { %s1417_s19 = smov 0   ;;  %s1419_s20 = smov 0  }
   0x3   :  { %s1421_s21 = smov 0  }
   0x4 LB: > { %s23_s22 = sadd.s32 1, %s1374_s19  ;;  %s26_s23 = sadd.s32 1, %s1378_s20  ;;  %s1382_s21 = sphi %s1421_s21, %s14_s21   ;;  %s1378_s20 = sphi %s1419_s20, %s1628_s20   ;;  %s1374_s19 = sphi %s1417_s19, %s1627_s19   ;;  %s1370_s18 = sphi %s1415_s18, %s1626_s18   ;;  %s1366_s17 = sphi %s1413_s17, %s1625_s17   ;;  %s1362_s16 = sphi %s1411_s16, %s1624_s16   ;;  %s1358_s15 = sphi %s1409_s15, %s1623_s15  }
   0x5   : > { %p24_p0 = scmp.ge.s32.totalorder %s23_s22, 2  ;;  %s995_s24 = sadd.s32 4294967295, %s1382_s21  }
   0x6   : > { %p149_p1 = scmp.ne.s32.totalorder %s1362_s16, %s1358_s15  ;;  %p150_p2 = scmp.eq.s32.totalorder %s995_s24, 3 }
   0x7   : > { %s1630_s22 = smov (%p24_p0, %s23_s22), 0  ;;  %s1632_s23 = smov (!%p24_p0, %s26_s23), %s1378_s20 }
   0x8   : > { %s135_s25 = ssub.s32 %s1374_s19, %s1630_s22  ;;  %p28_p3 = scmp.ge.s32.totalorder %s1632_s23, 2 }
   0x9   : > { %p999_p4 = scmp.ge.s32.totalorder %s1382_s21, 1  ;;  %p1455_p5 = por %p150_p2, %p149_p1 }
   0xa   : > { %p210_p6 = scmp.lt.s32.totalorder %s1382_s21, 5  ;;  %s1634_s23 = smov (%p28_p3, %s1632_s23), 0 }
   0xb   : > { %s134_s27 = ssub.s32 %s1378_s20, %s1634_s23  ;;  %s139_s29 = sadd.s32 1, %s1362_s16 }
   0xc   : > { %p211_p7 = pnand %p999_p4, %p210_p6  ;;  %s136_s28 = sor.u32 %s135_s25, %s134_s27 }
   0xd   : > { %p137_p8 = scmp.eq.s32.totalorder %s136_s28, 0  ;;  %s1003_s5 = sshll.u32 (!%p211_p7), %s1366_s17, 4 }
   0xe   : > { %214 = sbr.rel (%p211_p7) target bundleno = 372 (0x174), region = 36  ;;  %s1001_s6 = sshll.u32 (!%p211_p7), %s1370_s18, 4 }
   0xf   : > { %s1466_s30 = scalar_select %p137_p8, %s1362_s16, %s139_s29  }
  0x10   : > { %p257_p9 = scmp.lt.s32.totalorder (!%p211_p7), %s1003_s5, 31  ;;  %p251_p10 = scmp.lt.s32.totalorder (!%p211_p7), %s1001_s6, 31 }
  0x13   : > { %s1636_s5 = smov (!%p257_p9, %s1003_s5), 31  ;;  %s1638_s6 = smov (!%p251_p10, %s1001_s6), 31 }
  0x14   : > { %s1004_s7 = sshll.u32 %s1636_s5, 3  ;;  %s1002_s14 = sshll.u32 %s1638_s6, 3 }
  0x15   : > { %s1473_s10 = scalar_lea.vmem %s1618_s1, %s1004_s7  ;;  %s1478_s13 = scalar_lea.vmem %s1620_s3, %s1004_s7 }
  0x16   : > { %v314_v0 = vld [vmem:[%s1473_s10 + $0x70] sm:$0xff]  ;;  %v315_v1 = vld [vmem:[%s1473_s10 + $0x78] sm:$0xff]  ;;  %v312_v5 = vld [vmem:[%s1473_s10 + $0x60] sm:$0xff]  ;;  %s1495_s27 = scalar_lea.vmem %s1617_s0, %s1002_s14  ;;  %s1500_s5 = scalar_lea.vmem %s1619_s2, %s1002_s14 }
  0x17   : > { %v362_v2 = vld [vmem:[%s1478_s13 + $0x70] sm:$0xff]  ;;  %v323_v3 = vpack.c.bf16 %v315_v1, %v314_v0  ;;  %v363_v4 = vld [vmem:[%s1478_s13 + $0x78] sm:$0xff]  ;;  %v313_v6 = vld [vmem:[%s1473_s10 + $0x68] sm:$0xff]  ;;  %s247_s6 = sand.u32 1, %s1358_s15   ;;  %s1047_s8 = sshll.u32 (%p1455_p5), %s1370_s18, 5 }
  0x18   : > { %v371_v7 = vpack.c.bf16 %v363_v4, %v362_v2  ;;  %v322_v8 = vpack.c.bf16 %v313_v6, %v312_v5  ;;  %v360_v9 = vld [vmem:[%s1478_s13 + $0x60] sm:$0xff]  ;;  %v361_v10 = vld [vmem:[%s1478_s13 + $0x68] sm:$0xff]  ;;  %v310_v12 = vld [vmem:[%s1473_s10 + $0x50] sm:$0xff]  ;;  %s1000_s7 = sshll.u32 %s247_s6, 7  ;;  %s799_s26 = sadd.s32 (%p1455_p5), %s1366_s17, %s1047_s8 }
  0x19   : > { %1080 = vmatprep.subr.bf16.mxu0 %v323_v3  ;;  %v370_v11 = vpack.c.bf16 %v361_v10, %v360_v9  ;;  %v311_v13 = vld [vmem:[%s1473_s10 + $0x58] sm:$0xff]  ;;  %v358_v14 = vld [vmem:[%s1478_s13 + $0x50] sm:$0xff]  ;;  %v276_v18 = vld [vmem:[%s1495_s27] sm:$0xff]  ;;  %s1555_s15 = scalar_lea.vmem [#allocation2], %s1000_s7  ;;  %s1044_s9 = sshll.u32 (%p1455_p5), %s799_s26, 3 }
  0x1a   : > { %1112 = vmatprep.subr.bf16.mxu1 %v371_v7  ;;  %1081 = vmatpush3.bf16.xpose.msra.mxu0 %v323_v3  ;;  %v359_v15 = vld [vmem:[%s1478_s13 + $0x58] sm:$0xff]  ;;  %v321_v16 = vpack.c.bf16 %v311_v13, %v310_v12  ;;  %v277_v19 = vld [vmem:[%s1495_s27 + $0x8] sm:$0xff]  ;;  %v324_v20 = vld [vmem:[%s1500_s5] sm:$0xff]  ;;  %s801_s12 = scalar_lea.vmem (%p1455_p5), %s1621_s4, %s1044_s9 }
  0x1b   : > { %1113 = vmatpush3.bf16.xpose.msra.mxu1 %v371_v7  ;;  %1082 = vmatprep.subr.bf16.mxu0 %v322_v8  ;;  %v369_v17 = vpack.c.bf16 %v359_v15, %v358_v14  ;;  %v325_v21 = vld [vmem:[%s1500_s5 + $0x8] sm:$0xff]  ;;  %v292_v22 = vpack.c.bf16 %v277_v19, %v276_v18  ;;  %v308_v24 = vld [vmem:[%s1473_s10 + $0x40] sm:$0xff]  ;;  %v306_v30 = vld [vmem:[%s1473_s10 + $0x30] sm:$0xff] }
  0x1c   : > { %1114 = vmatprep.subr.bf16.mxu1 %v370_v11  ;;  %v340_v23 = vpack.c.bf16 %v325_v21, %v324_v20  ;;  %v309_v25 = vld [vmem:[%s1473_s10 + $0x48] sm:$0xff]  ;;  %v356_v26 = vld [vmem:[%s1478_s13 + $0x40] sm:$0xff]  ;;  %v307_v31 = vld [vmem:[%s1473_s10 + $0x38] sm:$0xff] }
  0x1d   : > { %1096 = vmatprep.mubr.bf16.mxu0 %v292_v22  ;;  %v357_v27 = vld [vmem:[%s1478_s13 + $0x48] sm:$0xff]  ;;  %v320_v28 = vpack.c.bf16 %v309_v25, %v308_v24  ;;  %v354_v32 = vld [vmem:[%s1478_s13 + $0x30] sm:$0xff]  ;;  %v355_v33 = vld [vmem:[%s1478_s13 + $0x38] sm:$0xff]  ;;  %v319_v34 = vpack.c.bf16 %v307_v31, %v306_v30 }
  0x1e   : > { %1128 = vmatprep.mubr.bf16.mxu1 %v340_v23  ;;  %v368_v29 = vpack.c.bf16 %v357_v27, %v356_v26  ;;  %v367_v35 = vpack.c.bf16 %v355_v33, %v354_v32  ;;  %v304_v36 = vld [vmem:[%s1473_s10 + $0x20] sm:$0xff]  ;;  %v305_v37 = vld [vmem:[%s1473_s10 + $0x28] sm:$0xff]  ;;  %v302_v42 = vld [vmem:[%s1473_s10 + $0x10] sm:$0xff] }
  0x1f   : > { %v352_v38 = vld [vmem:[%s1478_s13 + $0x20] sm:$0xff]  ;;  %v353_v39 = vld [vmem:[%s1478_s13 + $0x28] sm:$0xff]  ;;  %v318_v40 = vpack.c.bf16 %v305_v37, %v304_v36  ;;  %v303_v43 = vld [vmem:[%s1473_s10 + $0x18] sm:$0xff] }
  0x20   : > { %v366_v41 = vpack.c.bf16 %v353_v39, %v352_v38  ;;  %v350_v44 = vld [vmem:[%s1478_s13 + $0x10] sm:$0xff]  ;;  %v351_v45 = vld [vmem:[%s1478_s13 + $0x18] sm:$0xff]  ;;  %v317_v46 = vpack.c.bf16 %v303_v43, %v302_v42  ;;  %v300_v48 = vld [vmem:[%s1473_s10] sm:$0xff] }
  0x21   : > { %v365_v47 = vpack.c.bf16 %v351_v45, %v350_v44  ;;  %v301_v49 = vld [vmem:[%s1473_s10 + $0x8] sm:$0xff]  ;;  %v348_v50 = vld [vmem:[%s1478_s13] sm:$0xff]  ;;  %v278_v54 = vld [vmem:[%s1495_s27 + $0x10] sm:$0xff] }
  0x22   : > { %1083 = vmatpush3.bf16.xpose.msra.mxu0 %v322_v8  ;;  %v349_v51 = vld [vmem:[%s1478_s13 + $0x8] sm:$0xff]  ;;  %v316_v52 = vpack.c.bf16 %v301_v49, %v300_v48  ;;  %v279_v55 = vld [vmem:[%s1495_s27 + $0x18] sm:$0xff]  ;;  %v326_v56 = vld [vmem:[%s1500_s5 + $0x10] sm:$0xff] }
  0x23   : > { %1115 = vmatpush3.bf16.xpose.msra.mxu1 %v370_v11  ;;  %1084 = vmatprep.subr.bf16.mxu0 %v321_v16  ;;  %v364_v53 = vpack.c.bf16 %v349_v51, %v348_v50  ;;  %v327_v57 = vld [vmem:[%s1500_s5 + $0x18] sm:$0xff]  ;;  %v280_v58 = vld [vmem:[%s1495_s27 + $0x20] sm:$0xff]  ;;  %v281_v59 = vld [vmem:[%s1495_s27 + $0x28] sm:$0xff]  ;;  %v293_v62 = vpack.c.bf16 %v279_v55, %v278_v54 }
  0x24   : > { %1116 = vmatprep.subr.bf16.mxu1 %v369_v17  ;;  %v328_v60 = vld [vmem:[%s1500_s5 + $0x20] sm:$0xff]  ;;  %v329_v61 = vld [vmem:[%s1500_s5 + $0x28] sm:$0xff]  ;;  %v341_v63 = vpack.c.bf16 %v327_v57, %v326_v56  ;;  %v294_v0 = vpack.c.bf16 %v281_v59, %v280_v58  ;;  %v282_v2 = vld [vmem:[%s1495_s27 + $0x30] sm:$0xff] }
  0x25   : > { %v342_v1 = vpack.c.bf16 %v329_v61, %v328_v60  ;;  %v283_v3 = vld [vmem:[%s1495_s27 + $0x38] sm:$0xff]  ;;  %v330_v4 = vld [vmem:[%s1500_s5 + $0x30] sm:$0xff]  ;;  %v284_v6 = vld [vmem:[%s1495_s27 + $0x40] sm:$0xff] }
  0x26   : > { %v331_v5 = vld [vmem:[%s1500_s5 + $0x38] sm:$0xff]  ;;  %v285_v7 = vld [vmem:[%s1495_s27 + $0x48] sm:$0xff]  ;;  %v332_v8 = vld [vmem:[%s1500_s5 + $0x40] sm:$0xff]  ;;  %v295_v10 = vpack.c.bf16 %v283_v3, %v282_v2 }
  0x27   : > { %v333_v9 = vld [vmem:[%s1500_s5 + $0x48] sm:$0xff]  ;;  %v343_v11 = vpack.c.bf16 %v331_v5, %v330_v4  ;;  %v296_v12 = vpack.c.bf16 %v285_v7, %v284_v6  ;;  %v286_v14 = vld [vmem:[%s1495_s27 + $0x50] sm:$0xff]  ;;  %v287_v15 = vld [vmem:[%s1495_s27 + $0x58] sm:$0xff] }
  0x28   : > { %v344_v13 = vpack.c.bf16 %v333_v9, %v332_v8  ;;  %v288_v18 = vld [vmem:[%s1495_s27 + $0x60] sm:$0xff]  ;;  %v289_v19 = vld [vmem:[%s1495_s27 + $0x68] sm:$0xff]  ;;  %v297_v22 = vpack.c.bf16 %v287_v15, %v286_v14  ;;  %v290_v26 = vld [vmem:[%s1495_s27 + $0x70] sm:$0xff] }
  0x29   : > { %v336_v20 = vld [vmem:[%s1500_s5 + $0x60] sm:$0xff]  ;;  %v337_v21 = vld [vmem:[%s1500_s5 + $0x68] sm:$0xff]  ;;  %v298_v24 = vpack.c.bf16 %v289_v19, %v288_v18  ;;  %v291_v27 = vld [vmem:[%s1495_s27 + $0x78] sm:$0xff] }
  0x2a   : > { %1085 = vmatpush3.bf16.xpose.msra.mxu0 %v321_v16  ;;  %v334_v16 = vld [vmem:[%s1500_s5 + $0x50] sm:$0xff]  ;;  %v346_v25 = vpack.c.bf16 %v337_v21, %v336_v20  ;;  %v299_v30 = vpack.c.bf16 %v291_v27, %v290_v26 }
  0x2b   : > { %1117 = vmatpush3.bf16.xpose.msra.mxu1 %v369_v17  ;;  %1086 = vmatprep.subr.bf16.mxu0 %v320_v28  ;;  %v335_v17 = vld [vmem:[%s1500_s5 + $0x58] sm:$0xff] }
  0x2c   : > { %1118 = vmatprep.subr.bf16.mxu1 %v368_v29  ;;  %v345_v23 = vpack.c.bf16 %v335_v17, %v334_v16 }
  0x32   : > { %1087 = vmatpush3.bf16.xpose.msra.mxu0 %v320_v28  ;;  %v338_v28 = vld [vmem:[%s1500_s5 + $0x70] sm:$0xff] }
  0x33   : > { %1119 = vmatpush3.bf16.xpose.msra.mxu1 %v368_v29  ;;  %1088 = vmatprep.subr.bf16.mxu0 %v319_v34  ;;  %v339_v29 = vld [vmem:[%s1500_s5 + $0x78] sm:$0xff] }
  0x34   : > { %1120 = vmatprep.subr.bf16.mxu1 %v367_v35  ;;  %v347_v31 = vpack.c.bf16 %v339_v29, %v338_v28 }
  0x3a   : > { %1089 = vmatpush3.bf16.xpose.msra.mxu0 %v319_v34 }
  0x3b   : > { %1121 = vmatpush3.bf16.xpose.msra.mxu1 %v367_v35  ;;  %1090 = vmatprep.subr.bf16.mxu0 %v318_v40 }
  0x3c   : > { %1122 = vmatprep.subr.bf16.mxu1 %v366_v41 }
  0x42   : > { %1091 = vmatpush3.bf16.xpose.msra.mxu0 %v318_v40 }
  0x43   : > { %1123 = vmatpush3.bf16.xpose.msra.mxu1 %v366_v41  ;;  %1092 = vmatprep.subr.bf16.mxu0 %v317_v46 }
  0x44   : > { %1124 = vmatprep.subr.bf16.mxu1 %v365_v47 }
  0x4a   : > { %1093 = vmatpush3.bf16.xpose.msra.mxu0 %v317_v46 }
  0x4b   : > { %1125 = vmatpush3.bf16.xpose.msra.mxu1 %v365_v47  ;;  %1094 = vmatprep.subr.bf16.mxu0 %v316_v52 }
  0x4c   : > { %1126 = vmatprep.subr.bf16.mxu1 %v364_v53 }
  0x52   : > { %1095 = vmatpush3.bf16.xpose.msra.mxu0 %v316_v52 }
  0x53   : > { %1127 = vmatpush3.bf16.xpose.msra.mxu1 %v364_v53 }
  0x59   : > { %1097 = vmatmul.mubr.bf16.vlgmr.msra.gmra.mxu0 %v293_v62 }
  0x5a   : > { %1129 = vmatmul.mubr.bf16.vlgmr.msra.gmra.mxu1 %v341_v63  ;;  %1100 = vmatprep.mubr.bf16.mxu0 %v294_v0 }
  0x5b   : > { %1132 = vmatprep.mubr.bf16.mxu1 %v342_v1 }
  0x61   : > { %1101 = vmatmul.mubr.bf16.gmra.mxu0 %v295_v10 }
  0x62   : > { %1133 = vmatmul.mubr.bf16.gmra.mxu1 %v343_v11  ;;  %1104 = vmatprep.mubr.bf16.mxu0 %v296_v12 }
  0x63   : > { %1136 = vmatprep.mubr.bf16.mxu1 %v344_v13 }
  0x69   : > { %1105 = vmatmul.mubr.bf16.gmra.mxu0 %v297_v22 }
  0x6a   : > { %1137 = vmatmul.mubr.bf16.gmra.mxu1 %v345_v23  ;;  %1108 = vmatprep.mubr.bf16.mxu0 %v298_v24 }
  0x6b   : > { %1140 = vmatprep.mubr.bf16.mxu1 %v346_v25 }
  0x71   : > { %1109 = vmatmul.mubr.bf16.gmra.mxu0 %v299_v30 }
  0x72   : > { %1141 = vmatmul.mubr.bf16.gmra.mxu1 %v347_v31 }
 0x119   : > { %v1098_v32 = vpop.f32.mrf.mxu0 }
 0x11a   : > { %v1011_v33 = vmul.f32 -1.442695, %v1098_v32  ;;  %v1130_v34 = vpop.f32.mrf.mxu1 }
 0x11b   : > { %v1027_v35 = vmul.f32 -1.442695, %v1130_v34  ;;  %v406_v36 = vpop.f32.mrf.mxu0 }
 0x11c   : > { %1200 = vpow2.f32 %v1011_v33  ;;  %v1009_v37 = vmul.f32 -1.442695, %v406_v36  ;;  %v503_v38 = vpop.f32.mrf.mxu1 }
 0x11d   : > { %1202 = vpow2.f32 %v1027_v35  ;;  %v1025_v39 = vmul.f32 -1.442695, %v503_v38  ;;  %v1099_v40 = vpop.f32.mrf.mxu0 }
 0x11e   : > { %1204 = vpow2.f32 %v1009_v37  ;;  %v1012_v41 = vmul.f32 -1.442695, %v1099_v40  ;;  %v1131_v42 = vpop.f32.mrf.mxu1 }
 0x11f   : > { %1206 = vpow2.f32 %v1025_v39  ;;  %v1028_v43 = vmul.f32 -1.442695, %v1131_v42  ;;  %v409_v44 = vpop.f32.mrf.mxu0 }
 0x120   : > { %1208 = vpow2.f32 %v1012_v41  ;;  %v1010_v45 = vmul.f32 -1.442695, %v409_v44  ;;  %v506_v46 = vpop.f32.mrf.mxu1 }
 0x121   : > { %1210 = vpow2.f32 %v1028_v43  ;;  %v1026_v47 = vmul.f32 -1.442695, %v506_v46  ;;  %v1102_v48 = vpop.f32.mrf.mxu0 }
 0x122   : > { %1212 = vpow2.f32 %v1010_v45  ;;  %v1015_v49 = vmul.f32 -1.442695, %v1102_v48  ;;  %v1134_v50 = vpop.f32.mrf.mxu1 }
 0x123   : > { %1214 = vpow2.f32 %v1026_v47  ;;  %v1031_v51 = vmul.f32 -1.442695, %v1134_v50  ;;  %v422_v52 = vpop.f32.mrf.mxu0 }
 0x124   : > { %1216 = vpow2.f32 %v1015_v49  ;;  %v1013_v53 = vmul.f32 -1.442695, %v422_v52  ;;  %v519_v54 = vpop.f32.mrf.mxu1 }
 0x125   : > { %1218 = vpow2.f32 %v1031_v51  ;;  %v1029_v55 = vmul.f32 -1.442695, %v519_v54  ;;  %v1103_v56 = vpop.f32.mrf.mxu0 }
 0x126   : > { %1220 = vpow2.f32 %v1013_v53  ;;  %v1016_v57 = vmul.f32 -1.442695, %v1103_v56  ;;  %v1135_v58 = vpop.f32.mrf.mxu1 }
 0x127   : > { %1222 = vpow2.f32 %v1029_v55  ;;  %v1032_v59 = vmul.f32 -1.442695, %v1135_v58  ;;  %v425_v60 = vpop.f32.mrf.mxu0 }
 0x128   : > { %1224 = vpow2.f32 %v1016_v57  ;;  %v1014_v61 = vmul.f32 -1.442695, %v425_v60  ;;  %v522_v62 = vpop.f32.mrf.mxu1 }
 0x129   : > { %v1201_v63 = vpop.eup %1200  ;;  %1226 = vpow2.f32 %v1032_v59  ;;  %v1030_v0 = vmul.f32 -1.442695, %v522_v62  ;;  %v1106_v1 = vpop.f32.mrf.mxu0 }
 0x12a   : > { %v1203_v2 = vpop.eup %1202  ;;  %v616_v3 = vadd.f32 1.0, %v1201_v63  ;;  %1228 = vpow2.f32 %v1014_v61  ;;  %v1138_v4 = vpop.f32.mrf.mxu1  ;;  %v1019_v40 = vmul.f32 -1.442695, %v1106_v1 }
 0x12b   : > { %v1205_v5 = vpop.eup %1204  ;;  %v712_v6 = vadd.f32 1.0, %v1203_v2  ;;  %1230 = vpow2.f32 %v1030_v0  ;;  %v438_v7 = vpop.f32.mrf.mxu0  ;;  %v1035_v44 = vmul.f32 -1.442695, %v1138_v4 }
 0x12c   : > { %v1207_v8 = vpop.eup %1206  ;;  %1232 = vrcp.f32 %v616_v3  ;;  %v614_v9 = vadd.f32 1.0, %v1205_v5  ;;  %v535_v10 = vpop.f32.mrf.mxu1  ;;  %v1017_v46 = vmul.f32 -1.442695, %v438_v7 }
 0x12d   : > { %v1209_v11 = vpop.eup %1208  ;;  %1234 = vrcp.f32 %v712_v6  ;;  %v710_v12 = vadd.f32 1.0, %v1207_v8  ;;  %v1107_v17 = vpop.f32.mrf.mxu0  ;;  %v1033_v49 = vmul.f32 -1.442695, %v535_v10 }
 0x12e   : > { %v1211_v13 = vpop.eup %1210  ;;  %1236 = vrcp.f32 %v614_v9  ;;  %v617_v14 = vadd.f32 1.0, %v1209_v11  ;;  %v1139_v20 = vpop.f32.mrf.mxu1  ;;  %v1020_v52 = vmul.f32 -1.442695, %v1107_v17 }
 0x12f   : > { %v1213_v15 = vpop.eup %1212  ;;  %1238 = vrcp.f32 %v710_v12  ;;  %v713_v16 = vadd.f32 1.0, %v1211_v13  ;;  %v441_v27 = vpop.f32.mrf.mxu0  ;;  %v1036_v56 = vmul.f32 -1.442695, %v1139_v20 }
 0x130   : > { %v1215_v18 = vpop.eup %1214  ;;  %1240 = vrcp.f32 %v617_v14  ;;  %v615_v19 = vadd.f32 1.0, %v1213_v15  ;;  %v538_v30 = vpop.f32.mrf.mxu1  ;;  %v1018_v58 = vmul.f32 -1.442695, %v441_v27 }
 0x131   : > { %v1217_v21 = vpop.eup %1216  ;;  %1242 = vrcp.f32 %v713_v16  ;;  %v711_v22 = vadd.f32 1.0, %v1215_v18  ;;  %v1110_v37 = vpop.f32.mrf.mxu0  ;;  %v1034_v61 = vmul.f32 -1.442695, %v538_v30 }
 0x132   : > { %v1219_v23 = vpop.eup %1218  ;;  %1244 = vrcp.f32 %v615_v19  ;;  %v620_v24 = vadd.f32 1.0, %v1217_v21  ;;  %v1142_v41 = vpop.f32.mrf.mxu1  ;;  %v1023_v0 = vmul.f32 -1.442695, %v1110_v37 }
 0x133   : > { %v1221_v25 = vpop.eup %1220  ;;  %1246 = vrcp.f32 %v711_v22  ;;  %v716_v26 = vadd.f32 1.0, %v1219_v23  ;;  %v454_v50 = vpop.f32.mrf.mxu0  ;;  %v1039_v4 = vmul.f32 -1.442695, %v1142_v41 }
 0x134   : > { %v1223_v28 = vpop.eup %1222  ;;  %1248 = vrcp.f32 %v620_v24  ;;  %v618_v29 = vadd.f32 1.0, %v1221_v25  ;;  %v551_v53 = vpop.f32.mrf.mxu1  ;;  %v1021_v6 = vmul.f32 -1.442695, %v454_v50 }
 0x135   : > { %v1225_v31 = vpop.eup %1224  ;;  %1250 = vrcp.f32 %v716_v26  ;;  %v714_v32 = vadd.f32 1.0, %v1223_v28  ;;  %v1111_v62 = vpop.f32.mrf.mxu0  ;;  %v1037_v9 = vmul.f32 -1.442695, %v551_v53 }
 0x136   : > { %v1227_v33 = vpop.eup %1226  ;;  %1252 = vrcp.f32 %v618_v29  ;;  %v621_v34 = vadd.f32 1.0, %v1225_v31  ;;  %v1143_v1 = vpop.f32.mrf.mxu1  ;;  %v1024_v12 = vmul.f32 -1.442695, %v1111_v62 }
 0x137   : > { %v1229_v35 = vpop.eup %1228  ;;  %1254 = vrcp.f32 %v714_v32  ;;  %v717_v36 = vadd.f32 1.0, %v1227_v33  ;;  %v457_v10 = vpop.f32.mrf.mxu0  ;;  %v1040_v16 = vmul.f32 -1.442695, %v1143_v1 }
 0x138   : > { %v1231_v38 = vpop.eup %1230  ;;  %1256 = vrcp.f32 %v621_v34  ;;  %v619_v39 = vadd.f32 1.0, %v1229_v35  ;;  %v554_v13 = vpop.f32.mrf.mxu1  ;;  %v1022_v18 = vmul.f32 -1.442695, %v457_v10 }
 0x139   : > { %v1233_v42 = vpop.eup %1232  ;;  %1258 = vrcp.f32 %v717_v36  ;;  %v715_v43 = vadd.f32 1.0, %v1231_v38  ;;  %v1038_v21 = vmul.f32 -1.442695, %v554_v13 }
 0x13a   : > { %v1235_v45 = vpop.eup %1234  ;;  %1260 = vrcp.f32 %v619_v39 }
 0x13b   : > { %v1237_v47 = vpop.eup %1236  ;;  %v760_v48 = vadd.f32 %v1235_v45, %v1233_v42  ;;  %1262 = vrcp.f32 %v715_v43 }
 0x13c   : > { %v1239_v51 = vpop.eup %1238  ;;  %1264 = vpow2.f32 %v1019_v40 }
 0x13d   : > { %v1241_v54 = vpop.eup %1240  ;;  %776 = vst [vmem:[%s1555_s15 + $0x10] sm:$0xff] %v760_v48  ;;  %v758_v55 = vadd.f32 %v1239_v51, %v1237_v47  ;;  %1266 = vpow2.f32 %v1035_v44 }
 0x13e   : > { %v1243_v57 = vpop.eup %1242  ;;  %1268 = vpow2.f32 %v1017_v46 }
 0x13f   : > { %v1245_v59 = vpop.eup %1244  ;;  %774 = vst [vmem:[%s1555_s15] sm:$0xff] %v758_v55  ;;  %v761_v60 = vadd.f32 %v1243_v57, %v1241_v54  ;;  %1270 = vpow2.f32 %v1033_v49 }
 0x140   : > { %v1247_v63 = vpop.eup %1246  ;;  %1272 = vpow2.f32 %v1020_v52 }
 0x141   : > { %v1249_v2 = vpop.eup %1248  ;;  %777 = vst [vmem:[%s1555_s15 + $0x18] sm:$0xff] %v761_v60  ;;  %v759_v3 = vadd.f32 %v1247_v63, %v1245_v59  ;;  %1274 = vpow2.f32 %v1036_v56 }
 0x142   : > { %v1251_v5 = vpop.eup %1250  ;;  %1276 = vpow2.f32 %v1018_v58 }
 0x143   : > { %v1253_v7 = vpop.eup %1252  ;;  %775 = vst [vmem:[%s1555_s15 + $0x8] sm:$0xff] %v759_v3  ;;  %v764_v8 = vadd.f32 %v1251_v5, %v1249_v2  ;;  %1278 = vpow2.f32 %v1034_v61 }
 0x144   : > { %v1255_v11 = vpop.eup %1254  ;;  %1280 = vpow2.f32 %v1023_v0 }
 0x145   : > { %v1257_v14 = vpop.eup %1256  ;;  %780 = vst [vmem:[%s1555_s15 + $0x30] sm:$0xff] %v764_v8  ;;  %v762_v15 = vadd.f32 %v1255_v11, %v1253_v7  ;;  %1282 = vpow2.f32 %v1039_v4 }
 0x146   : > { %v1259_v17 = vpop.eup %1258  ;;  %1284 = vpow2.f32 %v1021_v6 }
 0x147   : > { %v1261_v19 = vpop.eup %1260  ;;  %778 = vst [vmem:[%s1555_s15 + $0x20] sm:$0xff] %v762_v15  ;;  %v765_v20 = vadd.f32 %v1259_v17, %v1257_v14  ;;  %1286 = vpow2.f32 %v1037_v9 }
 0x148   : > { %v1263_v22 = vpop.eup %1262  ;;  %1288 = vpow2.f32 %v1024_v12 }
 0x149   : > { %v1265_v23 = vpop.eup %1264  ;;  %781 = vst [vmem:[%s1555_s15 + $0x38] sm:$0xff] %v765_v20  ;;  %v763_v24 = vadd.f32 %v1263_v22, %v1261_v19  ;;  %1290 = vpow2.f32 %v1040_v16  ;;  %v860_v16 = vld [vmem:[%s1555_s15] sm:$0xff] (%p1455_p5)  ;;  %v866_v19 = vld [vmem:[%s1555_s15 + $0x18] sm:$0xff] (%p1455_p5) }
 0x14a   : > { %v1267_v25 = vpop.eup %1266  ;;  %v624_v26 = vadd.f32 1.0, %v1265_v23  ;;  %1292 = vpow2.f32 %v1022_v18  ;;  %v862_v17 = vld [vmem:[%s1555_s15 + $0x8] sm:$0xff] (%p1455_p5)  ;;  %v864_v18 = vld [vmem:[%s1555_s15 + $0x10] sm:$0xff] (%p1455_p5)  ;;  %861 = vst [vmem:[%s801_s12] sm:$0xff] (%p1455_p5), %v860_v16  ;;  %867 = vst [vmem:[%s801_s12 + $0x30] sm:$0xff] (%p1455_p5), %v866_v19 }
 0x14b   : > { %v1269_v27 = vpop.eup %1268  ;;  %779 = vst [vmem:[%s1555_s15 + $0x28] sm:$0xff] %v763_v24  ;;  %v720_v28 = vadd.f32 1.0, %v1267_v25  ;;  %1294 = vpow2.f32 %v1038_v21  ;;  %863 = vst [vmem:[%s801_s12 + $0x10] sm:$0xff] (%p1455_p5), %v862_v17 }
 0x14c   : > { %v1271_v29 = vpop.eup %1270  ;;  %1296 = vrcp.f32 %v624_v26  ;;  %v622_v30 = vadd.f32 1.0, %v1269_v27  ;;  %v872_v22 = vld [vmem:[%s1555_s15 + $0x30] sm:$0xff] (%p1455_p5)  ;;  %865 = vst [vmem:[%s801_s12 + $0x20] sm:$0xff] (%p1455_p5), %v864_v18 }
 0x14d   : > { %v1273_v31 = vpop.eup %1272  ;;  %1298 = vrcp.f32 %v720_v28  ;;  %v718_v32 = vadd.f32 1.0, %v1271_v29  ;;  %873 = vst [vmem:[%s801_s12 + $0x60] sm:$0xff] (%p1455_p5), %v872_v22 }
 0x14e   : > { %v1275_v33 = vpop.eup %1274  ;;  %1300 = vrcp.f32 %v622_v30  ;;  %v625_v34 = vadd.f32 1.0, %v1273_v31  ;;  %v868_v20 = vld [vmem:[%s1555_s15 + $0x20] sm:$0xff] (%p1455_p5) }
 0x14f   : > { %v1277_v35 = vpop.eup %1276  ;;  %1302 = vrcp.f32 %v718_v32  ;;  %v721_v36 = vadd.f32 1.0, %v1275_v33  ;;  %869 = vst [vmem:[%s801_s12 + $0x40] sm:$0xff] (%p1455_p5), %v868_v20 }
 0x150   : > { %v1279_v37 = vpop.eup %1278  ;;  %1304 = vrcp.f32 %v625_v34  ;;  %v623_v38 = vadd.f32 1.0, %v1277_v35  ;;  %v874_v23 = vld [vmem:[%s1555_s15 + $0x38] sm:$0xff] (%p1455_p5) }
 0x151   : > { %v1281_v39 = vpop.eup %1280  ;;  %1306 = vrcp.f32 %v721_v36  ;;  %v719_v40 = vadd.f32 1.0, %v1279_v37  ;;  %875 = vst [vmem:[%s801_s12 + $0x70] sm:$0xff] (%p1455_p5), %v874_v23 }
 0x152   : > { %v1283_v41 = vpop.eup %1282  ;;  %1308 = vrcp.f32 %v623_v38  ;;  %v628_v42 = vadd.f32 1.0, %v1281_v39  ;;  %v870_v21 = vld [vmem:[%s1555_s15 + $0x28] sm:$0xff] (%p1455_p5) }
 0x153   : > { %v1285_v43 = vpop.eup %1284  ;;  %1310 = vrcp.f32 %v719_v40  ;;  %v724_v44 = vadd.f32 1.0, %v1283_v41  ;;  %871 = vst [vmem:[%s801_s12 + $0x50] sm:$0xff] (%p1455_p5), %v870_v21 }
 0x154   : > { %v1287_v45 = vpop.eup %1286  ;;  %1312 = vrcp.f32 %v628_v42  ;;  %v626_v46 = vadd.f32 1.0, %v1285_v43 }
 0x155   : > { %v1289_v47 = vpop.eup %1288  ;;  %1314 = vrcp.f32 %v724_v44  ;;  %v722_v48 = vadd.f32 1.0, %v1287_v45 }
 0x156   : > { %v1291_v49 = vpop.eup %1290  ;;  %1316 = vrcp.f32 %v626_v46  ;;  %v629_v50 = vadd.f32 1.0, %v1289_v47 }
 0x157   : > { %v1293_v51 = vpop.eup %1292  ;;  %1318 = vrcp.f32 %v722_v48  ;;  %v725_v52 = vadd.f32 1.0, %v1291_v49 }
 0x158   : > { %v1295_v53 = vpop.eup %1294  ;;  %1320 = vrcp.f32 %v629_v50  ;;  %v627_v54 = vadd.f32 1.0, %v1293_v51 }
 0x159   : > { %v1297_v55 = vpop.eup %1296  ;;  %1322 = vrcp.f32 %v725_v52  ;;  %v723_v56 = vadd.f32 1.0, %v1295_v53 }
 0x15a   : > { %v1299_v57 = vpop.eup %1298  ;;  %1324 = vrcp.f32 %v627_v54 }
 0x15b   : > { %v1301_v58 = vpop.eup %1300  ;;  %v768_v59 = vadd.f32 %v1299_v57, %v1297_v55  ;;  %1326 = vrcp.f32 %v723_v56 }
 0x15c   : > { %v1303_v60 = vpop.eup %1302 }
 0x15d   : > { %v1305_v61 = vpop.eup %1304  ;;  %784 = vst [vmem:[%s1555_s15 + $0x50] sm:$0xff] %v768_v59  ;;  %v766_v62 = vadd.f32 %v1303_v60, %v1301_v58 }
 0x15e   : > { %v1307_v63 = vpop.eup %1306 }
 0x15f   : > { %v1309_v0 = vpop.eup %1308  ;;  %782 = vst [vmem:[%s1555_s15 + $0x40] sm:$0xff] %v766_v62  ;;  %v769_v1 = vadd.f32 %v1307_v63, %v1305_v61 }
 0x160   : > { %v1311_v2 = vpop.eup %1310 }
 0x161   : > { %v1313_v3 = vpop.eup %1312  ;;  %785 = vst [vmem:[%s1555_s15 + $0x58] sm:$0xff] %v769_v1  ;;  %v767_v4 = vadd.f32 %v1311_v2, %v1309_v0 }
 0x162   : > { %v1315_v5 = vpop.eup %1314 }
 0x163   : > { %v1317_v6 = vpop.eup %1316  ;;  %783 = vst [vmem:[%s1555_s15 + $0x48] sm:$0xff] %v767_v4  ;;  %v772_v7 = vadd.f32 %v1315_v5, %v1313_v3 }
 0x164   : > { %v1319_v8 = vpop.eup %1318  ;;  %v880_v26 = vld [vmem:[%s1555_s15 + $0x50] sm:$0xff] (%p1455_p5) }
 0x165   : > { %v1321_v9 = vpop.eup %1320  ;;  %788 = vst [vmem:[%s1555_s15 + $0x70] sm:$0xff] %v772_v7  ;;  %v770_v10 = vadd.f32 %v1319_v8, %v1317_v6  ;;  %881 = vst [vmem:[%s801_s12 + $0xa0] sm:$0xff] (%p1455_p5), %v880_v26 }
 0x166   : > { %v1323_v11 = vpop.eup %1322  ;;  %v876_v24 = vld [vmem:[%s1555_s15 + $0x40] sm:$0xff] (%p1455_p5) }
 0x167   : > { %v1325_v12 = vpop.eup %1324  ;;  %786 = vst [vmem:[%s1555_s15 + $0x60] sm:$0xff] %v770_v10  ;;  %v773_v13 = vadd.f32 %v1323_v11, %v1321_v9  ;;  %796 = sbr.rel (!%p1455_p5) target bundleno = 372 (0x174), region = 40  ;;  %877 = vst [vmem:[%s801_s12 + $0x80] sm:$0xff] (%p1455_p5), %v876_v24 }
 0x168   : > { %v1327_v14 = vpop.eup %1326  ;;  %v882_v27 = vld [vmem:[%s1555_s15 + $0x58] sm:$0xff] (%p1455_p5) }
 0x169   : > { %789 = vst [vmem:[%s1555_s15 + $0x78] sm:$0xff] %v773_v13  ;;  %v771_v15 = vadd.f32 %v1327_v14, %v1325_v12  ;;  %883 = vst [vmem:[%s801_s12 + $0xb0] sm:$0xff] (%p1455_p5), %v882_v27 }
 0x16a   : > { %v878_v25 = vld [vmem:[%s1555_s15 + $0x48] sm:$0xff] (%p1455_p5) }
 0x16b   : > { %787 = vst [vmem:[%s1555_s15 + $0x68] sm:$0xff] %v771_v15  ;;  %879 = vst [vmem:[%s801_s12 + $0x90] sm:$0xff] (%p1455_p5), %v878_v25 }
 0x16c   : > { %v888_v30 = vld [vmem:[%s1555_s15 + $0x70] sm:$0xff] }
 0x16d   : > { %889 = vst [vmem:[%s801_s12 + $0xe0] sm:$0xff] %v888_v30 }
 0x16e   : > { %v884_v28 = vld [vmem:[%s1555_s15 + $0x60] sm:$0xff] }
 0x16f   : > { %885 = vst [vmem:[%s801_s12 + $0xc0] sm:$0xff] %v884_v28 }
 0x170   : > { %v890_v31 = vld [vmem:[%s1555_s15 + $0x78] sm:$0xff] }
 0x171   : > { %891 = vst [vmem:[%s801_s12 + $0xf0] sm:$0xff] %v890_v31 }
 0x172   : > { %v886_v29 = vld [vmem:[%s1555_s15 + $0x68] sm:$0xff] }
 0x173   : > { %887 = vst [vmem:[%s801_s12 + $0xd0] sm:$0xff] %v886_v29 }
 0x174 PF: > { %s14_s21 = sadd.s32 1, %s1382_s21   ;;  %s1623_s15 = smov %s1362_s16 }
 0x175   : > { %p11_p11 = scmp.ge.s32.totalorder %s14_s21, 6   ;;  %s1624_s16 = smov %s1466_s30 }
 0x176   : > { %s1625_s17 = smov %s1374_s19  ;;  %s1626_s18 = smov %s1378_s20 }
 0x177   : > { %s1627_s19 = smov %s1630_s22  ;;  %s1628_s20 = smov %s1634_s23 }
 0x178   :  { %13 = sbr.rel (!%p11_p11) target bundleno = 4 (0x4), region = 113 }

// kernel: igae_forward.2
= control target key start
LH: loop header
LB: loop body
LE: loop exit
PB: predicated region body
PF: predicated region fallthrough
CT: control target
= control target key end

     0   :  { %s2845_s15 = smov 0   ;;  %s2847_s16 = smov 0   ;;  %s3481_s0 = inlined_call_operand.vmem [shape: bf16[256,128], index: 0, kind: input, shape index: {}]   ;;  %s3482_s1 = inlined_call_operand.vmem [shape: bf16[6,128,128], index: 1, kind: input, shape index: {}]   ;;  %s3483_s2 = inlined_call_operand.vmem [shape: bf16[256,256], index: 2, kind: input, shape index: {}]   ;;  %s3484_s3 = inlined_call_operand.vmem [shape: f32[256,128], index: 3, kind: output, shape index: {0}]   ;;  %s3485_s4 = inlined_call_operand.vmem [shape: f32[256,128], index: 4, kind: output, shape index: {1}]  }
   0x1   :  { %s2849_s17 = smov 0  }
   0x2 LB: > { %s27_s18 = sadd.s32 1, %s2814_s16  ;;  %p1881_p0 = scmp.ge.s32.totalorder %s2818_s17, 1  ;;  %s2818_s17 = sphi %s2849_s17, %s15_s17   ;;  %s2814_s16 = sphi %s2847_s16, %s3487_s16   ;;  %s2810_s15 = sphi %s2845_s15, %s3486_s15  }
   0x3   : > { %p29_p1 = scmp.ge.s32.totalorder %s27_s18, 6  ;;  %p179_p2 = scmp.lt.s32.totalorder %s2818_s17, 7 }
   0x5   : > { %s3489_s18 = smov (%p29_p1, %s27_s18), 0  ;;  %p180_p3 = pnand %p1881_p0, %p179_p2 }
   0x6   : > { %p206_p4 = scmp.lt.s32.totalorder (!%p180_p3), %s2810_s15, 5  ;;  %p219_p5 = scmp.eq.s32.totalorder (!%p180_p3), %s2810_s15, 0 }
   0x7   : > { %183 = sbr.rel (%p180_p3) target bundleno = 713 (0x2c9), region = 32 }
   0xc   : > { %s207_s19 = scalar_select %p206_p4, %s2810_s15, 5  ;;  %v225_v0 = vld [vmem:[%s3481_s0] sm:$0xff] (%p219_p5)   ;;  %v227_v1 = vld [vmem:[%s3481_s0 + $0x8] sm:$0xff] (%p219_p5)   ;;  %v229_v2 = vld [vmem:[%s3481_s0 + $0x10] sm:$0xff] (%p219_p5)  }
   0xd   : > { %224 = sbr.rel (!%p219_p5) target bundleno = 21 (0x15), region = 36  ;;  %257 = vst [vmem:[#allocation2] sm:$0xff] (%p219_p5), %v225_v0   ;;  %259 = vst [vmem:[#allocation2 + $0x8] sm:$0xff] (%p219_p5), %v227_v1   ;;  %v231_v3 = vld [vmem:[%s3481_s0 + $0x18] sm:$0xff] (%p219_p5)   ;;  %v233_v4 = vld [vmem:[%s3481_s0 + $0x20] sm:$0xff] (%p219_p5)  }
   0xe   : > { %s2099_s20 = sshll.u32 %s207_s19, 6  ;;  %261 = vst [vmem:[#allocation2 + $0x10] sm:$0xff] (%p219_p5), %v229_v2   ;;  %v235_v5 = vld [vmem:[%s3481_s0 + $0x28] sm:$0xff] (%p219_p5)   ;;  %263 = vst [vmem:[#allocation2 + $0x18] sm:$0xff] (%p219_p5), %v231_v3   ;;  %v237_v6 = vld [vmem:[%s3481_s0 + $0x30] sm:$0xff] (%p219_p5)  }
   0xf   : > { %s2871_s23 = scalar_lea.vmem %s3482_s1, %s2099_s20  ;;  %265 = vst [vmem:[#allocation2 + $0x20] sm:$0xff] (%p219_p5), %v233_v4   ;;  %267 = vst [vmem:[#allocation2 + $0x28] sm:$0xff] (%p219_p5), %v235_v5   ;;  %v239_v7 = vld [vmem:[%s3481_s0 + $0x38] sm:$0xff] (%p219_p5)   ;;  %v241_v8 = vld [vmem:[%s3481_s0 + $0x40] sm:$0xff] (%p219_p5)  }
  0x10   : > { %269 = vst [vmem:[#allocation2 + $0x30] sm:$0xff] (%p219_p5), %v237_v6   ;;  %271 = vst [vmem:[#allocation2 + $0x38] sm:$0xff] (%p219_p5), %v239_v7   ;;  %v243_v9 = vld [vmem:[%s3481_s0 + $0x48] sm:$0xff] (%p219_p5)   ;;  %v245_v10 = vld [vmem:[%s3481_s0 + $0x50] sm:$0xff] (%p219_p5)  }
  0x11   : > { %273 = vst [vmem:[#allocation2 + $0x40] sm:$0xff] (%p219_p5), %v241_v8   ;;  %v247_v11 = vld [vmem:[%s3481_s0 + $0x58] sm:$0xff] (%p219_p5)   ;;  %275 = vst [vmem:[#allocation2 + $0x48] sm:$0xff] (%p219_p5), %v243_v9   ;;  %v249_v12 = vld [vmem:[%s3481_s0 + $0x60] sm:$0xff] (%p219_p5)  }
  0x12   : > { %277 = vst [vmem:[#allocation2 + $0x50] sm:$0xff] %v245_v10   ;;  %279 = vst [vmem:[#allocation2 + $0x58] sm:$0xff] %v247_v11   ;;  %v251_v13 = vld [vmem:[%s3481_s0 + $0x68] sm:$0xff]   ;;  %v253_v14 = vld [vmem:[%s3481_s0 + $0x70] sm:$0xff]  }
  0x13   : > { %281 = vst [vmem:[#allocation2 + $0x60] sm:$0xff] %v249_v12   ;;  %283 = vst [vmem:[#allocation2 + $0x68] sm:$0xff] %v251_v13   ;;  %v255_v15 = vld [vmem:[%s3481_s0 + $0x78] sm:$0xff]  }
  0x14   : > { %285 = vst [vmem:[#allocation2 + $0x70] sm:$0xff] %v253_v14   ;;  %287 = vst [vmem:[#allocation2 + $0x78] sm:$0xff] %v255_v15  }
  0x15 PF: > { %v2708_v16 = vld [vmem:[%s2871_s23 + $0x38] sm:$0xff]   ;;  %p292_p6 = scmp.lt.s32.totalorder %s2810_s15, 0  ;;  %v2709_v17 = vld [vmem:[%s2871_s23 + $0x30] sm:$0xff]   ;;  %s293_s9 = ssub.s32 0, %s2810_s15  ;;  %v2710_v18 = vld [vmem:[%s2871_s23 + $0x28] sm:$0xff]  }
  0x16   : > { %2620 = vmatprep.subr.bf16.mxu0 %v2708_v16  ;;  %s1885_s10 = smin.u32 %s2810_s15, %s293_s9  ;;  %v2711_v19 = vld [vmem:[%s2871_s23 + $0x20] sm:$0xff]   ;;  %v2712_v20 = vld [vmem:[%s2871_s23 + $0x18] sm:$0xff]   ;;  %v2713_v22 = vld [vmem:[%s2871_s23 + $0x10] sm:$0xff]   ;;  %p660_p8 = scmp.eq.s32.totalorder %s2810_s15, 2 }
  0x17   : > { %2621 = vmatpush3.bf16.msra.mxu0 %v2708_v16  ;;  %s295_s11 = sand.u32 1, %s1885_s10   ;;  %v2714_v23 = vld [vmem:[%s2871_s23 + $0x8] sm:$0xff]   ;;  %v2715_v24 = vld [vmem:[%s2871_s23] sm:$0xff]  }
  0x18   : > { %2622 = vmatprep.subr.bf16.mxu0 %v2709_v17  ;;  %s296_s12 = ssub.s32 0, %s295_s11  ;;  %v2750_v40 = vld [vmem:[%s3483_s2 + $0x44] ss:$8 sps:$4 sm:$0xff]  }
  0x19   : > { %s3491_s12 = smov (!%p292_p6, %s296_s12), %s295_s11  ;;  %1303 = vmatprep.mubr.bf16.mxu1 %v2750_v40 }
  0x1a   : > { %p1887_p7 = scmp.lt.s32.totalorder %s3491_s12, 0  ;;  %s302_s13 = sadd.s32 2, %s3491_s12 }
  0x1b   : > { %2623 = vmatpush3.bf16.msra.mxu0 %v2709_v17  ;;  %s661_s21 = scalar_select %p660_p8, 1.0, 0.2 }
  0x1c   : > { %2624 = vmatprep.subr.bf16.mxu0 %v2710_v18  ;;  %s3493_s13 = smov (!%p1887_p7, %s302_s13), %s3491_s12 }
  0x1d   : > { %s2101_s14 = sshll.u32 %s3493_s13, 7  ;;  %v2957_v42 = vstv %s661_s21  ;;  %p1997_p9 = scmp.ne.s32.totalorder %s3493_s13, 0 }
  0x1e   : > { %s2932_s19 = scalar_lea.vmem [#allocation2], %s2101_s14 }
  0x1f   : > { %2625 = vmatpush3.bf16.msra.mxu0 %v2710_v18  ;;  %v2716_v21 = vld [vmem:[%s2932_s19] sm:$0xff]   ;;  %v2717_v25 = vld [vmem:[%s2932_s19 + $0x8] sm:$0xff]   ;;  %v2718_v26 = vld [vmem:[%s2932_s19 + $0x10] sm:$0xff]  }
  0x20   : > { %2626 = vmatprep.subr.bf16.mxu0 %v2711_v19  ;;  %2636 = vmatprep.mubr.bf16.mxu0 %v2716_v21  ;;  %v2719_v27 = vld [vmem:[%s2932_s19 + $0x18] sm:$0xff]   ;;  %v2720_v28 = vld [vmem:[%s2932_s19 + $0x20] sm:$0xff]   ;;  %v2721_v29 = vld [vmem:[%s2932_s19 + $0x28] sm:$0xff]  }
  0x21   : > { %v2722_v30 = vld [vmem:[%s2932_s19 + $0x30] sm:$0xff]   ;;  %v2723_v31 = vld [vmem:[%s2932_s19 + $0x38] sm:$0xff]   ;;  %v2724_v32 = vld [vmem:[%s2932_s19 + $0x40] sm:$0xff]  }
  0x22   : > { %v2725_v33 = vld [vmem:[%s2932_s19 + $0x48] sm:$0xff]   ;;  %v2726_v34 = vld [vmem:[%s2932_s19 + $0x50] sm:$0xff]   ;;  %v2727_v35 = vld [vmem:[%s2932_s19 + $0x58] sm:$0xff]  }
  0x23   : > { %2627 = vmatpush3.bf16.msra.mxu0 %v2711_v19  ;;  %v2728_v36 = vld [vmem:[%s2932_s19 + $0x60] sm:$0xff]   ;;  %v2729_v37 = vld [vmem:[%s2932_s19 + $0x68] sm:$0xff]   ;;  %v2730_v38 = vld [vmem:[%s2932_s19 + $0x70] sm:$0xff]  }
  0x24   : > { %2628 = vmatprep.subr.bf16.mxu0 %v2712_v20  ;;  %v2731_v39 = vld [vmem:[%s2932_s19 + $0x78] sm:$0xff]  }
  0x27   : > { %2629 = vmatpush3.bf16.msra.mxu0 %v2712_v20 }
  0x28   : > { %2630 = vmatprep.subr.bf16.mxu0 %v2713_v22 }
  0x2b   : > { %2631 = vmatpush3.bf16.msra.mxu0 %v2713_v22 }
  0x2c   : > { %2632 = vmatprep.subr.bf16.mxu0 %v2714_v23 }
  0x2f   : > { %2633 = vmatpush3.bf16.msra.mxu0 %v2714_v23 }
  0x30   : > { %2634 = vmatprep.subr.bf16.mxu0 %v2715_v24 }
  0x33   : > { %2635 = vmatpush3.bf16.msra.mxu0 %v2715_v24 }
  0x36   : > { %2637 = vmatmul.mubr.bf16.vlgmr.msra.gmra.mxu0 %v2717_v25 }
  0x37   : > { %2640 = vmatprep.mubr.bf16.mxu0 %v2718_v26 }
  0x3e   : > { %2641 = vmatmul.mubr.bf16.gmra.mxu0 %v2719_v27 }
  0x3f   : > { %2644 = vmatprep.mubr.bf16.mxu0 %v2720_v28 }
  0x46   : > { %2645 = vmatmul.mubr.bf16.gmra.mxu0 %v2721_v29 }
  0x47   : > { %2648 = vmatprep.mubr.bf16.mxu0 %v2722_v30 }
  0x4e   : > { %2649 = vmatmul.mubr.bf16.gmra.mxu0 %v2723_v31 }
  0x4f   : > { %2652 = vmatprep.mubr.bf16.mxu0 %v2724_v32 }
  0x56   : > { %2653 = vmatmul.mubr.bf16.gmra.mxu0 %v2725_v33 }
  0x57   : > { %2656 = vmatprep.mubr.bf16.mxu0 %v2726_v34 }
  0x5e   : > { %2657 = vmatmul.mubr.bf16.gmra.mxu0 %v2727_v35 }
  0x5f   : > { %2660 = vmatprep.mubr.bf16.mxu0 %v2728_v36  ;;  %v2774_v36 = vld [vmem:[%s3483_s2 + $0x4] ss:$8 sps:$4 sm:$0xff]  }
  0x66   : > { %2661 = vmatmul.mubr.bf16.gmra.mxu0 %v2729_v37 }
  0x67   : > { %2664 = vmatprep.mubr.bf16.mxu0 %v2730_v38 }
  0x6e   : > { %2665 = vmatmul.mubr.bf16.gmra.mxu0 %v2731_v39 }
  0x6f   : > { %1271 = vmatprep.mubr.bf16.mxu0 %v2774_v36 }
  0xf6   : > { %v2638_v41 = vpop.f32.mrf.mxu0 }
  0xf7   : > { %v697_v44 = vmul.f32 %v2638_v41, %v2957_v42  ;;  %vm664_vm0 = vcmp.gt.f32.partialorder %v2638_v41, 0.0 }
  0xf8   : > { %v533_v43 = vpop.f32.mrf.mxu0 }
  0xf9   : > { %v695_v46 = vmul.f32 %v2957_v42, %v533_v43  ;;  %vm662_vm2 = vcmp.gt.f32.partialorder %v533_v43, 0.0  ;;  %v729_v49 = vsel %vm664_vm0, %v2638_v41, %v697_v44 }
  0xfa   : > { %v2639_v45 = vpop.f32.mrf.mxu0 }
  0xfb   : > { %vm665_vm1 = vcmp.gt.f32.partialorder %v2639_v45, 0.0  ;;  %v698_v47 = vmul.f32 %v2639_v45, %v2957_v42  ;;  %v727_v54 = vsel %vm662_vm2, %v533_v43, %v695_v46 }
  0xfc   : > { %v536_v48 = vpop.f32.mrf.mxu0 }
  0xfd   : > { %v730_v50 = vsel %vm665_vm1, %v2639_v45, %v698_v47  ;;  %vm663_vm3 = vcmp.gt.f32.partialorder %v536_v48, 0.0  ;;  %v696_v51 = vmul.f32 %v2957_v42, %v536_v48 }
  0xfe   : > { %v2206_v52 = vpack.c.bf16 %v730_v50, %v729_v49  ;;  %v2642_v53 = vpop.f32.mrf.mxu0 }
  0xff   : > { %v728_v55 = vsel %vm663_vm3, %v536_v48, %v696_v51  ;;  %v701_v58 = vmul.f32 %v2642_v53, %v2957_v42  ;;  %vm668_vm4 = vcmp.gt.f32.partialorder %v2642_v53, 0.0 }
 0x100   : > { %2438 = vst [vmem:[#allocation3 + $0x8] sm:$0xff] %v2206_v52   ;;  %v2201_v56 = vpack.c.bf16 %v728_v55, %v727_v54  ;;  %v549_v57 = vpop.f32.mrf.mxu0 }
 0x101   : > { %v699_v60 = vmul.f32 %v2957_v42, %v549_v57  ;;  %vm666_vm6 = vcmp.gt.f32.partialorder %v549_v57, 0.0  ;;  %v733_v63 = vsel %vm668_vm4, %v2642_v53, %v701_v58 }
 0x102   : > { %2202 = vst [vmem:[#allocation3] sm:$0xff] %v2201_v56   ;;  %v2643_v59 = vpop.f32.mrf.mxu0 }
 0x103   : > { %vm669_vm5 = vcmp.gt.f32.partialorder %v2643_v59, 0.0  ;;  %v702_v61 = vmul.f32 %v2643_v59, %v2957_v42  ;;  %v731_v4 = vsel %vm666_vm6, %v549_v57, %v699_v60 }
 0x104   : > { %v552_v62 = vpop.f32.mrf.mxu0 }
 0x105   : > { %v734_v0 = vsel %vm669_vm5, %v2643_v59, %v702_v61  ;;  %vm667_vm7 = vcmp.gt.f32.partialorder %v552_v62, 0.0  ;;  %v700_v1 = vmul.f32 %v2957_v42, %v552_v62 }
 0x106   : > { %v2216_v2 = vpack.c.bf16 %v734_v0, %v733_v63  ;;  %v2646_v3 = vpop.f32.mrf.mxu0 }
 0x107   : > { %v732_v5 = vsel %vm667_vm7, %v552_v62, %v700_v1  ;;  %v705_v8 = vmul.f32 %v2646_v3, %v2957_v42  ;;  %vm672_vm8 = vcmp.gt.f32.partialorder %v2646_v3, 0.0 }
 0x108   : > { %2440 = vst [vmem:[#allocation3 + $0x18] sm:$0xff] %v2216_v2   ;;  %v2211_v6 = vpack.c.bf16 %v732_v5, %v731_v4  ;;  %v565_v7 = vpop.f32.mrf.mxu0 }
 0x109   : > { %v703_v10 = vmul.f32 %v2957_v42, %v565_v7  ;;  %vm670_vm10 = vcmp.gt.f32.partialorder %v565_v7, 0.0  ;;  %v737_v13 = vsel %vm672_vm8, %v2646_v3, %v705_v8 }
 0x10a   : > { %2439 = vst [vmem:[#allocation3 + $0x10] sm:$0xff] %v2211_v6   ;;  %v2647_v9 = vpop.f32.mrf.mxu0 }
 0x10b   : > { %vm673_vm9 = vcmp.gt.f32.partialorder %v2647_v9, 0.0  ;;  %v706_v11 = vmul.f32 %v2647_v9, %v2957_v42  ;;  %v735_v18 = vsel %vm670_vm10, %v565_v7, %v703_v10 }
 0x10c   : > { %v568_v12 = vpop.f32.mrf.mxu0 }
 0x10d   : > { %v738_v14 = vsel %vm673_vm9, %v2647_v9, %v706_v11  ;;  %vm671_vm11 = vcmp.gt.f32.partialorder %v568_v12, 0.0  ;;  %v704_v15 = vmul.f32 %v2957_v42, %v568_v12 }
 0x10e   : > { %v2226_v16 = vpack.c.bf16 %v738_v14, %v737_v13  ;;  %v2650_v17 = vpop.f32.mrf.mxu0 }
 0x10f   : > { %v736_v19 = vsel %vm671_vm11, %v568_v12, %v704_v15  ;;  %v709_v22 = vmul.f32 %v2650_v17, %v2957_v42  ;;  %vm676_vm12 = vcmp.gt.f32.partialorder %v2650_v17, 0.0  ;;  %v2741_v36 = vld [vmem:[#allocation3 + $0x18] sm:$0xff]  }
 0x110   : > { %2442 = vst [vmem:[#allocation3 + $0x28] sm:$0xff] %v2226_v16   ;;  %v2221_v20 = vpack.c.bf16 %v736_v19, %v735_v18  ;;  %v581_v21 = vpop.f32.mrf.mxu0 }
 0x111   : > { %v707_v24 = vmul.f32 %v2957_v42, %v581_v21  ;;  %vm674_vm14 = vcmp.gt.f32.partialorder %v581_v21, 0.0  ;;  %v741_v27 = vsel %vm676_vm12, %v2650_v17, %v709_v22 }
 0x112   : > { %2441 = vst [vmem:[#allocation3 + $0x20] sm:$0xff] %v2221_v20   ;;  %v2651_v23 = vpop.f32.mrf.mxu0 }
 0x113   : > { %vm677_vm13 = vcmp.gt.f32.partialorder %v2651_v23, 0.0  ;;  %v710_v25 = vmul.f32 %v2651_v23, %v2957_v42  ;;  %v739_v32 = vsel %vm674_vm14, %v581_v21, %v707_v24 }
 0x114   : > { %v584_v26 = vpop.f32.mrf.mxu0 }
 0x115   : > { %v742_v28 = vsel %vm677_vm13, %v2651_v23, %v710_v25  ;;  %vm675_vm15 = vcmp.gt.f32.partialorder %v584_v26, 0.0  ;;  %v708_v29 = vmul.f32 %v2957_v42, %v584_v26 }
 0x116   : > { %v2236_v30 = vpack.c.bf16 %v742_v28, %v741_v27  ;;  %v2654_v31 = vpop.f32.mrf.mxu0 }
 0x117   : > { %v740_v33 = vsel %vm675_vm15, %v584_v26, %v708_v29  ;;  %v713_v37 = vmul.f32 %v2654_v31, %v2957_v42  ;;  %vm680_vm0 = vcmp.gt.f32.partialorder %v2654_v31, 0.0 }
 0x118   : > { %2444 = vst [vmem:[#allocation3 + $0x38] sm:$0xff] %v2236_v30   ;;  %v2231_v34 = vpack.c.bf16 %v740_v33, %v739_v32  ;;  %v597_v35 = vpop.f32.mrf.mxu0 }
 0x119   : > { %v711_v39 = vmul.f32 %v2957_v42, %v597_v35  ;;  %vm678_vm2 = vcmp.gt.f32.partialorder %v597_v35, 0.0  ;;  %v745_v43 = vsel %vm680_vm0, %v2654_v31, %v713_v37 }
 0x11a   : > { %2443 = vst [vmem:[#allocation3 + $0x30] sm:$0xff] %v2231_v34   ;;  %v2655_v38 = vpop.f32.mrf.mxu0  ;;  %v2739_v34 = vld [vmem:[#allocation3 + $0x20] sm:$0xff]  }
 0x11b   : > { %vm681_vm1 = vcmp.gt.f32.partialorder %v2655_v38, 0.0  ;;  %v714_v40 = vmul.f32 %v2655_v38, %v2957_v42  ;;  %v743_v48 = vsel %vm678_vm2, %v597_v35, %v711_v39 }
 0x11c   : > { %v600_v41 = vpop.f32.mrf.mxu0 }
 0x11d   : > { %v746_v44 = vsel %vm681_vm1, %v2655_v38, %v714_v40  ;;  %vm679_vm3 = vcmp.gt.f32.partialorder %v600_v41, 0.0  ;;  %v712_v45 = vmul.f32 %v2957_v42, %v600_v41  ;;  %v2743_v38 = vld [vmem:[#allocation3 + $0x10] sm:$0xff]   ;;  %v2745_v40 = vld [vmem:[#allocation3 + $0x8] sm:$0xff]  }
 0x11e   : > { %v2246_v46 = vpack.c.bf16 %v746_v44, %v745_v43  ;;  %v2658_v47 = vpop.f32.mrf.mxu0  ;;  %v2747_v43 = vld [vmem:[#allocation3] sm:$0xff]  }
 0x11f   : > { %v744_v49 = vsel %vm679_vm3, %v600_v41, %v712_v45  ;;  %v717_v52 = vmul.f32 %v2658_v47, %v2957_v42  ;;  %vm684_vm4 = vcmp.gt.f32.partialorder %v2658_v47, 0.0  ;;  %v2733_v29 = vld [vmem:[#allocation3 + $0x38] sm:$0xff]   ;;  %v2748_v44 = vld [vmem:[%s3483_s2 + $0x40] ss:$8 sps:$4 sm:$0xff]  }
 0x120   : > { %2446 = vst [vmem:[#allocation3 + $0x48] sm:$0xff] %v2246_v46   ;;  %v2241_v50 = vpack.c.bf16 %v744_v49, %v743_v48  ;;  %v613_v51 = vpop.f32.mrf.mxu0  ;;  %v2772_v45 = vld [vmem:[%s3483_s2] ss:$8 sps:$4 sm:$0xff]   ;;  %v2751_v46 = vld [vmem:[%s3483_s2 + $0x54] ss:$8 sps:$4 sm:$0xff]  }
 0x121   : > { %v715_v54 = vmul.f32 %v2957_v42, %v613_v51  ;;  %vm682_vm6 = vcmp.gt.f32.partialorder %v613_v51, 0.0  ;;  %v749_v57 = vsel %vm684_vm4, %v2658_v47, %v717_v52  ;;  %v2735_v31 = vld [vmem:[#allocation3 + $0x30] sm:$0xff]   ;;  %v2756_v52 = vld [vmem:[%s3483_s2 + $0x60] ss:$8 sps:$4 sm:$0xff]  }
 0x122   : > { %2445 = vst [vmem:[#allocation3 + $0x40] sm:$0xff] %v2241_v50   ;;  %v2659_v53 = vpop.f32.mrf.mxu0  ;;  %v2778_v47 = vld [vmem:[%s3483_s2 + $0x14] ss:$8 sps:$4 sm:$0xff]   ;;  %v2753_v48 = vld [vmem:[%s3483_s2 + $0x50] ss:$8 sps:$4 sm:$0xff]  }
 0x123   : > { %vm685_vm5 = vcmp.gt.f32.partialorder %v2659_v53, 0.0  ;;  %v718_v55 = vmul.f32 %v2659_v53, %v2957_v42  ;;  %v747_v62 = vsel %vm682_vm6, %v613_v51, %v715_v54  ;;  %v2780_v49 = vld [vmem:[%s3483_s2 + $0x10] ss:$8 sps:$4 sm:$0xff]   ;;  %v2754_v50 = vld [vmem:[%s3483_s2 + $0x64] ss:$8 sps:$4 sm:$0xff]  }
 0x124   : > { %v616_v56 = vpop.f32.mrf.mxu0  ;;  %v2784_v51 = vld [vmem:[%s3483_s2 + $0x24] ss:$8 sps:$4 sm:$0xff]   ;;  %v2757_v54 = vld [vmem:[%s3483_s2 + $0x74] ss:$8 sps:$4 sm:$0xff]  }
 0x125   : > { %v750_v58 = vsel %vm685_vm5, %v2659_v53, %v718_v55  ;;  %vm683_vm7 = vcmp.gt.f32.partialorder %v616_v56, 0.0  ;;  %v716_v59 = vmul.f32 %v2957_v42, %v616_v56  ;;  %v2786_v53 = vld [vmem:[%s3483_s2 + $0x20] ss:$8 sps:$4 sm:$0xff]   ;;  %v2790_v55 = vld [vmem:[%s3483_s2 + $0x34] ss:$8 sps:$4 sm:$0xff]  }
 0x126   : > { %v2256_v60 = vpack.c.bf16 %v750_v58, %v749_v57  ;;  %v2662_v61 = vpop.f32.mrf.mxu0  ;;  %v2792_v57 = vld [vmem:[%s3483_s2 + $0x30] ss:$8 sps:$4 sm:$0xff]   ;;  %v2760_v58 = vld [vmem:[%s3483_s2 + $0x84] ss:$8 sps:$4 sm:$0xff]  }
 0x127   : > { %v748_v63 = vsel %vm683_vm7, %v616_v56, %v716_v59  ;;  %v721_v2 = vmul.f32 %v2662_v61, %v2957_v42  ;;  %vm688_vm8 = vcmp.gt.f32.partialorder %v2662_v61, 0.0  ;;  %v2744_v39 = vld [vmem:[#allocation3 + $0x48] sm:$0xff]   ;;  %v2759_v56 = vld [vmem:[%s3483_s2 + $0x70] ss:$8 sps:$4 sm:$0xff]  }
 0x128   : > { %2448 = vst [vmem:[#allocation3 + $0x58] sm:$0xff] %v2256_v60   ;;  %v2251_v0 = vpack.c.bf16 %v748_v63, %v747_v62  ;;  %v629_v1 = vpop.f32.mrf.mxu0  ;;  %v2762_v59 = vld [vmem:[%s3483_s2 + $0x80] ss:$8 sps:$4 sm:$0xff]   ;;  %v2763_v60 = vld [vmem:[%s3483_s2 + $0x94] ss:$8 sps:$4 sm:$0xff]  }
 0x129   : > { %v719_v4 = vmul.f32 %v2957_v42, %v629_v1  ;;  %vm686_vm10 = vcmp.gt.f32.partialorder %v629_v1, 0.0  ;;  %v753_v7 = vsel %vm688_vm8, %v2662_v61, %v721_v2  ;;  %v2746_v41 = vld [vmem:[#allocation3 + $0x40] sm:$0xff]   ;;  %v2765_v61 = vld [vmem:[%s3483_s2 + $0x90] ss:$8 sps:$4 sm:$0xff]  }
 0x12a   : > { %2447 = vst [vmem:[#allocation3 + $0x50] sm:$0xff] %v2251_v0   ;;  %v2663_v3 = vpop.f32.mrf.mxu0  ;;  %v2766_v62 = vld [vmem:[%s3483_s2 + $0xa4] ss:$8 sps:$4 sm:$0xff]   ;;  %v2768_v63 = vld [vmem:[%s3483_s2 + $0xa0] ss:$8 sps:$4 sm:$0xff]  }
 0x12b   : > { %vm689_vm9 = vcmp.gt.f32.partialorder %v2663_v3, 0.0  ;;  %v722_v5 = vmul.f32 %v2663_v3, %v2957_v42  ;;  %v751_v12 = vsel %vm686_vm10, %v629_v1, %v719_v4  ;;  %v2769_v0 = vld [vmem:[%s3483_s2 + $0xb4] ss:$8 sps:$4 sm:$0xff]   ;;  %v2771_v1 = vld [vmem:[%s3483_s2 + $0xb0] ss:$8 sps:$4 sm:$0xff]  }
 0x12c   : > { %v632_v6 = vpop.f32.mrf.mxu0  ;;  %v2775_v2 = vld [vmem:[%s3483_s2 + $0xc4] ss:$8 sps:$4 sm:$0xff]   ;;  %v2781_v4 = vld [vmem:[%s3483_s2 + $0xd4] ss:$8 sps:$4 sm:$0xff]  }
 0x12d   : > { %v754_v8 = vsel %vm689_vm9, %v2663_v3, %v722_v5  ;;  %vm687_vm11 = vcmp.gt.f32.partialorder %v632_v6, 0.0  ;;  %v720_v9 = vmul.f32 %v2957_v42, %v632_v6  ;;  %v2777_v3 = vld [vmem:[%s3483_s2 + $0xc0] ss:$8 sps:$4 sm:$0xff]   ;;  %v2783_v5 = vld [vmem:[%s3483_s2 + $0xd0] ss:$8 sps:$4 sm:$0xff]  }
 0x12e   : > { %v2266_v10 = vpack.c.bf16 %v754_v8, %v753_v7  ;;  %v2666_v11 = vpop.f32.mrf.mxu0  ;;  %v2789_v7 = vld [vmem:[%s3483_s2 + $0xe0] ss:$8 sps:$4 sm:$0xff]   ;;  %v2793_v8 = vld [vmem:[%s3483_s2 + $0xf4] ss:$8 sps:$4 sm:$0xff]  }
 0x12f   : > { %v752_v13 = vsel %vm687_vm11, %v632_v6, %v720_v9  ;;  %v725_v16 = vmul.f32 %v2666_v11, %v2957_v42  ;;  %vm692_vm12 = vcmp.gt.f32.partialorder %v2666_v11, 0.0  ;;  %v2740_v35 = vld [vmem:[#allocation3 + $0x58] sm:$0xff]   ;;  %v2787_v6 = vld [vmem:[%s3483_s2 + $0xe4] ss:$8 sps:$4 sm:$0xff]  }
 0x130   : > { %2450 = vst [vmem:[#allocation3 + $0x68] sm:$0xff] %v2266_v10   ;;  %v2261_v14 = vpack.c.bf16 %v752_v13, %v751_v12  ;;  %v645_v15 = vpop.f32.mrf.mxu0  ;;  %v2795_v9 = vld [vmem:[%s3483_s2 + $0xf0] ss:$8 sps:$4 sm:$0xff]  }
 0x131   : > { %v723_v18 = vmul.f32 %v2957_v42, %v645_v15  ;;  %vm690_vm14 = vcmp.gt.f32.partialorder %v645_v15, 0.0  ;;  %v757_v21 = vsel %vm692_vm12, %v2666_v11, %v725_v16  ;;  %v2742_v37 = vld [vmem:[#allocation3 + $0x50] sm:$0xff]  }
 0x132   : > { %2449 = vst [vmem:[#allocation3 + $0x60] sm:$0xff] %v2261_v14   ;;  %v2667_v17 = vpop.f32.mrf.mxu0 }
 0x133   : > { %vm693_vm13 = vcmp.gt.f32.partialorder %v2667_v17, 0.0  ;;  %v726_v19 = vmul.f32 %v2667_v17, %v2957_v42  ;;  %v755_v25 = vsel %vm690_vm14, %v645_v15, %v723_v18 }
 0x134   : > { %v648_v20 = vpop.f32.mrf.mxu0 }
 0x135   : > { %v758_v22 = vsel %vm693_vm13, %v2667_v17, %v726_v19  ;;  %vm691_vm15 = vcmp.gt.f32.partialorder %v648_v20, 0.0  ;;  %v724_v23 = vmul.f32 %v2957_v42, %v648_v20  ;;  %v2737_v42 = vld [vmem:[#allocation3 + $0x28] sm:$0xff]  }
 0x136   : > { %v2276_v24 = vpack.c.bf16 %v758_v22, %v757_v21 }
 0x137   : > { %v756_v26 = vsel %vm691_vm15, %v648_v20, %v724_v23  ;;  %v2736_v32 = vld [vmem:[#allocation3 + $0x68] sm:$0xff]  }
 0x138   : > { %2452 = vst [vmem:[#allocation3 + $0x78] sm:$0xff] %v2276_v24   ;;  %v2271_v27 = vpack.c.bf16 %v756_v26, %v755_v25 }
 0x139   : > { %v2738_v33 = vld [vmem:[#allocation3 + $0x60] sm:$0xff]  }
 0x13a   : > { %2451 = vst [vmem:[#allocation3 + $0x70] sm:$0xff] %v2271_v27  }
 0x13f   : > { %v2732_v28 = vld [vmem:[#allocation3 + $0x78] sm:$0xff]  }
 0x140   : > { %2508 = vmatprep.subr.bf16.mxu0 %v2732_v28  ;;  %2668 = vmatprep.subr.bf16.mxu1 %v2732_v28 }
 0x141   : > { %v2734_v30 = vld [vmem:[#allocation3 + $0x70] sm:$0xff]   ;;  %2509 = vmatpush3.bf16.msra.mxu0 %v2733_v29  ;;  %2676 = vmatpush3.bf16.msra.mxu1 %v2733_v29 }
 0x142   : > { %2510 = vmatprep.subr.bf16.mxu0 %v2734_v30  ;;  %2669 = vmatprep.subr.bf16.mxu1 %v2734_v30 }
 0x145   : > { %2511 = vmatpush3.bf16.msra.mxu0 %v2735_v31  ;;  %2677 = vmatpush3.bf16.msra.mxu1 %v2735_v31 }
 0x146   : > { %2512 = vmatprep.subr.bf16.mxu0 %v2736_v32  ;;  %2670 = vmatprep.subr.bf16.mxu1 %v2736_v32 }
 0x149   : > { %2513 = vmatpush3.bf16.msra.mxu0 %v2737_v42  ;;  %2678 = vmatpush3.bf16.msra.mxu1 %v2737_v42 }
 0x14a   : > { %2514 = vmatprep.subr.bf16.mxu0 %v2738_v33  ;;  %2671 = vmatprep.subr.bf16.mxu1 %v2738_v33 }
 0x14d   : > { %2515 = vmatpush3.bf16.msra.mxu0 %v2739_v34  ;;  %2679 = vmatpush3.bf16.msra.mxu1 %v2739_v34 }
 0x14e   : > { %2516 = vmatprep.subr.bf16.mxu0 %v2740_v35  ;;  %2672 = vmatprep.subr.bf16.mxu1 %v2740_v35 }
 0x151   : > { %2517 = vmatpush3.bf16.msra.mxu0 %v2741_v36  ;;  %2680 = vmatpush3.bf16.msra.mxu1 %v2741_v36 }
 0x152   : > { %2518 = vmatprep.subr.bf16.mxu0 %v2742_v37  ;;  %2673 = vmatprep.subr.bf16.mxu1 %v2742_v37 }
 0x155   : > { %2519 = vmatpush3.bf16.msra.mxu0 %v2743_v38  ;;  %2681 = vmatpush3.bf16.msra.mxu1 %v2743_v38 }
 0x156   : > { %2520 = vmatprep.subr.bf16.mxu0 %v2744_v39  ;;  %2674 = vmatprep.subr.bf16.mxu1 %v2744_v39 }
 0x159   : > { %2521 = vmatpush3.bf16.msra.mxu0 %v2745_v40  ;;  %2682 = vmatpush3.bf16.msra.mxu1 %v2745_v40 }
 0x15a   : > { %2522 = vmatprep.subr.bf16.mxu0 %v2746_v41  ;;  %2675 = vmatprep.subr.bf16.mxu1 %v2746_v41 }
 0x15d   : > { %2523 = vmatpush3.bf16.msra.mxu0 %v2747_v43  ;;  %2683 = vmatpush3.bf16.msra.mxu1 %v2747_v43 }
 0x160   : > { %1304 = vmatmul.mubr.bf16.vlgmr.msra.gmra.mxu1 %v2748_v44  ;;  %1272 = vmatmul.mubr.bf16.vlgmr.msra.gmra.mxu0 %v2772_v45 }
 0x161   : > { %1311 = vmatprep.mubr.bf16.mxu1 %v2751_v46  ;;  %1279 = vmatprep.mubr.bf16.mxu0 %v2778_v47 }
 0x168   : > { %1312 = vmatmul.mubr.bf16.gmra.mxu1 %v2753_v48  ;;  %1280 = vmatmul.mubr.bf16.gmra.mxu0 %v2780_v49 }
 0x169   : > { %1319 = vmatprep.mubr.bf16.mxu1 %v2754_v50  ;;  %1287 = vmatprep.mubr.bf16.mxu0 %v2784_v51 }
 0x170   : > { %1320 = vmatmul.mubr.bf16.gmra.mxu1 %v2756_v52  ;;  %1288 = vmatmul.mubr.bf16.gmra.mxu0 %v2786_v53 }
 0x171   : > { %1327 = vmatprep.mubr.bf16.mxu1 %v2757_v54  ;;  %1295 = vmatprep.mubr.bf16.mxu0 %v2790_v55 }
 0x178   : > { %1328 = vmatmul.mubr.bf16.gmra.mxu1 %v2759_v56  ;;  %1296 = vmatmul.mubr.bf16.gmra.mxu0 %v2792_v57 }
 0x179   : > { %1335 = vmatprep.mubr.bf16.mxu1 %v2760_v58 }
 0x180   : > { %1336 = vmatmul.mubr.bf16.gmra.mxu1 %v2762_v59 }
 0x181   : > { %1343 = vmatprep.mubr.bf16.mxu1 %v2763_v60 }
 0x188   : > { %1344 = vmatmul.mubr.bf16.gmra.mxu1 %v2765_v61 }
 0x189   : > { %1351 = vmatprep.mubr.bf16.mxu1 %v2766_v62 }
 0x190   : > { %1352 = vmatmul.mubr.bf16.gmra.mxu1 %v2768_v63 }
 0x191   : > { %1359 = vmatprep.mubr.bf16.mxu1 %v2769_v0 }
 0x198   : > { %1360 = vmatmul.mubr.bf16.gmra.mxu1 %v2771_v1 }
 0x199   : > { %1367 = vmatprep.mubr.bf16.mxu1 %v2775_v2 }
 0x1a0   : > { %1368 = vmatmul.mubr.bf16.gmra.mxu1 %v2777_v3 }
 0x1a1   : > { %1375 = vmatprep.mubr.bf16.mxu1 %v2781_v4 }
 0x1a8   : > { %1376 = vmatmul.mubr.bf16.gmra.mxu1 %v2783_v5 }
 0x1a9   : > { %1383 = vmatprep.mubr.bf16.mxu1 %v2787_v6 }
 0x1b0   : > { %1384 = vmatmul.mubr.bf16.gmra.mxu1 %v2789_v7 }
 0x1b1   : > { %1391 = vmatprep.mubr.bf16.mxu1 %v2793_v8 }
 0x1b8   : > { %1392 = vmatmul.mubr.bf16.gmra.mxu1 %v2795_v9 }
 0x220   : > { %v2548_v10 = vpop.f32.mrf.mxu1  ;;  %v2524_v11 = vpop.f32.mrf.mxu0 }
 0x222   : > { %v2549_v12 = vpop.f32.mrf.mxu1  ;;  %v2525_v13 = vpop.f32.mrf.mxu0 }
 0x223   : > { %v3084_v14 = vadd.f32 %v2549_v12, %v2548_v10  ;;  %v3086_v15 = vadd.f32 %v2525_v13, %v2524_v11 }
 0x224   : > { %v2551_v16 = vpop.f32.mrf.mxu1  ;;  %v2527_v17 = vpop.f32.mrf.mxu0 }
 0x226   : > { %v2552_v18 = vpop.f32.mrf.mxu1  ;;  %v2528_v19 = vpop.f32.mrf.mxu0 }
 0x227   : > { %v3088_v20 = vadd.f32 %v2552_v18, %v2551_v16  ;;  %v3090_v21 = vadd.f32 %v2528_v19, %v2527_v17 }
 0x228   : > { %v2554_v22 = vpop.f32.mrf.mxu1  ;;  %v2530_v23 = vpop.f32.mrf.mxu0 }
 0x22a   : > { %v2555_v24 = vpop.f32.mrf.mxu1  ;;  %v2531_v25 = vpop.f32.mrf.mxu0 }
 0x22b   : > { %v3092_v26 = vadd.f32 %v2555_v24, %v2554_v22  ;;  %v3094_v27 = vadd.f32 %v2531_v25, %v2530_v23 }
 0x22c   : > { %v2557_v28 = vpop.f32.mrf.mxu1  ;;  %v2533_v29 = vpop.f32.mrf.mxu0 }
 0x22e   : > { %v2558_v30 = vpop.f32.mrf.mxu1  ;;  %v2534_v31 = vpop.f32.mrf.mxu0 }
 0x22f   : > { %v3096_v32 = vadd.f32 %v2558_v30, %v2557_v28  ;;  %v3098_v42 = vadd.f32 %v2534_v31, %v2533_v29 }
 0x230   : > { %v2560_v33 = vpop.f32.mrf.mxu1  ;;  %v2536_v34 = vpop.f32.mrf.mxu0 }
 0x232   : > { %v2561_v35 = vpop.f32.mrf.mxu1  ;;  %v2537_v36 = vpop.f32.mrf.mxu0 }
 0x233   : > { %v3100_v37 = vadd.f32 %v2561_v35, %v2560_v33  ;;  %v3102_v38 = vadd.f32 %v2537_v36, %v2536_v34 }
 0x234   : > { %v2563_v39 = vpop.f32.mrf.mxu1  ;;  %v2539_v40 = vpop.f32.mrf.mxu0 }
 0x236   : > { %v2564_v41 = vpop.f32.mrf.mxu1  ;;  %v2540_v43 = vpop.f32.mrf.mxu0 }
 0x237   : > { %v3104_v44 = vadd.f32 %v2564_v41, %v2563_v39  ;;  %v3106_v45 = vadd.f32 %v2540_v43, %v2539_v40 }
 0x238   : > { %v2566_v46 = vpop.f32.mrf.mxu1  ;;  %v2542_v47 = vpop.f32.mrf.mxu0 }
 0x23a   : > { %v2567_v48 = vpop.f32.mrf.mxu1  ;;  %v2543_v49 = vpop.f32.mrf.mxu0 }
 0x23b   : > { %v3108_v50 = vadd.f32 %v2567_v48, %v2566_v46  ;;  %v3110_v51 = vadd.f32 %v2543_v49, %v2542_v47 }
 0x23c   : > { %v2569_v52 = vpop.f32.mrf.mxu1  ;;  %v2545_v53 = vpop.f32.mrf.mxu0 }
 0x23e   : > { %v2570_v54 = vpop.f32.mrf.mxu1  ;;  %v2546_v55 = vpop.f32.mrf.mxu0 }
 0x23f   : > { %v3112_v56 = vadd.f32 %v2570_v54, %v2569_v52  ;;  %v3114_v57 = vadd.f32 %v2546_v55, %v2545_v53 }
 0x240   : > { %v2572_v58 = vpop.f32.mrf.mxu1 }
 0x242   : > { %v2573_v59 = vpop.f32.mrf.mxu1 }
 0x243   : > { %v3116_v60 = vadd.f32 %v2573_v59, %v2572_v58 }
 0x244   : > { %v2575_v61 = vpop.f32.mrf.mxu1 }
 0x246   : > { %v2576_v62 = vpop.f32.mrf.mxu1 }
 0x247   : > { %v3118_v63 = vadd.f32 %v2576_v62, %v2575_v61 }
 0x248   : > { %v2578_v0 = vpop.f32.mrf.mxu1 }
 0x24a   : > { %v2579_v1 = vpop.f32.mrf.mxu1 }
 0x24b   : > { %v3120_v2 = vadd.f32 %v2579_v1, %v2578_v0 }
 0x24c   : > { %v2581_v3 = vpop.f32.mrf.mxu1 }
 0x24e   : > { %v2582_v4 = vpop.f32.mrf.mxu1 }
 0x24f   : > { %v3122_v5 = vadd.f32 %v2582_v4, %v2581_v3 }
 0x250   : > { %v2584_v6 = vpop.f32.mrf.mxu1 }
 0x252   : > { %v2585_v7 = vpop.f32.mrf.mxu1 }
 0x253   : > { %v3124_v8 = vadd.f32 %v2585_v7, %v2584_v6 }
 0x254   : > { %v2587_v9 = vpop.f32.mrf.mxu1 }
 0x256   : > { %v2588_v10 = vpop.f32.mrf.mxu1 }
 0x257   : > { %v3126_v11 = vadd.f32 %v2588_v10, %v2587_v9 }
 0x258   : > { %v2590_v12 = vpop.f32.mrf.mxu1 }
 0x25a   : > { %v2591_v13 = vpop.f32.mrf.mxu1 }
 0x25b   : > { %v3128_v16 = vadd.f32 %v2591_v13, %v2590_v12 }
 0x25c   : > { %v2593_v17 = vpop.f32.mrf.mxu1 }
 0x25e   : > { %v2594_v18 = vpop.f32.mrf.mxu1 }
 0x25f   : > { %v3130_v19 = vadd.f32 %v2594_v18, %v2593_v17 }
 0x260   : > { %v2596_v22 = vpop.f32.mrf.mxu1 }
 0x262   : > { %v2597_v23 = vpop.f32.mrf.mxu1 }
 0x263   : > { %v3132_v24 = vadd.f32 %v2597_v23, %v2596_v22 }
 0x264   : > { %v2599_v25 = vpop.f32.mrf.mxu1 }
 0x266   : > { %v2600_v28 = vpop.f32.mrf.mxu1 }
 0x267   : > { %v3134_v29 = vadd.f32 %v2600_v28, %v2599_v25 }
 0x268   : > { %v2602_v30 = vpop.f32.mrf.mxu1 }
 0x26a   : > { %v2603_v31 = vpop.f32.mrf.mxu1 }
 0x26b   : > { %v3136_v33 = vadd.f32 %v2603_v31, %v2602_v30 }
 0x26c   : > { %v2605_v34 = vpop.f32.mrf.mxu1 }
 0x26e   : > { %v2606_v35 = vpop.f32.mrf.mxu1 }
 0x26f   : > { %v3138_v36 = vadd.f32 %v2606_v35, %v2605_v34 }
 0x270   : > { %v2608_v39 = vpop.f32.mrf.mxu1 }
 0x272   : > { %v2609_v40 = vpop.f32.mrf.mxu1 }
 0x273   : > { %v3140_v41 = vadd.f32 %v2609_v40, %v2608_v39 }
 0x274   : > { %v2611_v43 = vpop.f32.mrf.mxu1 }
 0x276   : > { %v2612_v46 = vpop.f32.mrf.mxu1 }
 0x277   : > { %v3142_v47 = vadd.f32 %v2612_v46, %v2611_v43 }
 0x278   : > { %v2614_v48 = vpop.f32.mrf.mxu1 }
 0x27a   : > { %v2615_v49 = vpop.f32.mrf.mxu1 }
 0x27b   : > { %v3144_v52 = vadd.f32 %v2615_v49, %v2614_v48  ;;  %1432 = sbr.rel (%p1997_p9) target bundleno = 650 (0x28a), region = 44 }
 0x27c   : > { %v2617_v53 = vpop.f32.mrf.mxu1 }
 0x27e   : > { %v2618_v54 = vpop.f32.mrf.mxu1 }
 0x27f   : > { %v3146_v55 = vadd.f32 %v2618_v54, %v2617_v53 }
 0x280   : > { %v2281_v58 = vpack.c.bf16 %v3090_v21, %v3086_v15  ;;  %v2286_v59 = vpack.c.bf16 %v3098_v42, %v3094_v27  ;;  %v2291_v61 = vpack.c.bf16 %v3106_v45, %v3102_v38  ;;  %v2296_v62 = vpack.c.bf16 %v3114_v57, %v3110_v51 }
 0x281   : > { %v2301_v0 = vpack.c.bf16 %v3088_v20, %v3084_v14  ;;  %v2306_v1 = vpack.c.bf16 %v3096_v32, %v3092_v26  ;;  %v2311_v3 = vpack.c.bf16 %v3104_v44, %v3100_v37  ;;  %v2316_v4 = vpack.c.bf16 %v3112_v56, %v3108_v50 }
 0x282   : > { %2453 = vst [vmem:[#allocation2 + $0x80] sm:$0xff] %v2281_v58   ;;  %2454 = vst [vmem:[#allocation2 + $0x88] sm:$0xff] %v2286_v59   ;;  %v2321_v6 = vpack.c.bf16 %v3118_v63, %v3116_v60  ;;  %v2326_v7 = vpack.c.bf16 %v3122_v5, %v3120_v2  ;;  %v2331_v9 = vpack.c.bf16 %v3126_v11, %v3124_v8 }
 0x283   : > { %2455 = vst [vmem:[#allocation2 + $0x90] sm:$0xff] %v2291_v61   ;;  %2456 = vst [vmem:[#allocation2 + $0x98] sm:$0xff] %v2296_v62   ;;  %v2336_v10 = vpack.c.bf16 %v3130_v19, %v3128_v16  ;;  %v2341_v12 = vpack.c.bf16 %v3134_v29, %v3132_v24  ;;  %v2346_v13 = vpack.c.bf16 %v3138_v36, %v3136_v33 }
 0x284   : > { %2457 = vst [vmem:[#allocation2 + $0xa0] sm:$0xff] %v2301_v0   ;;  %2458 = vst [vmem:[#allocation2 + $0xa8] sm:$0xff] %v2306_v1   ;;  %v2351_v17 = vpack.c.bf16 %v3142_v47, %v3140_v41  ;;  %v2356_v18 = vpack.c.bf16 %v3146_v55, %v3144_v52 }
 0x285   : > { %2459 = vst [vmem:[#allocation2 + $0xb0] sm:$0xff] %v2311_v3   ;;  %2460 = vst [vmem:[#allocation2 + $0xb8] sm:$0xff] %v2316_v4  }
 0x286   : > { %2461 = vst [vmem:[#allocation2 + $0xc0] sm:$0xff] %v2321_v6   ;;  %2462 = vst [vmem:[#allocation2 + $0xc8] sm:$0xff] %v2326_v7  }
 0x287   : > { %2463 = vst [vmem:[#allocation2 + $0xd0] sm:$0xff] %v2331_v9   ;;  %2464 = vst [vmem:[#allocation2 + $0xd8] sm:$0xff] %v2336_v10  }
 0x288   : > { %2465 = vst [vmem:[#allocation2 + $0xe0] sm:$0xff] %v2341_v12   ;;  %2466 = vst [vmem:[#allocation2 + $0xe8] sm:$0xff] %v2346_v13  }
 0x289   : > { %2467 = vst [vmem:[#allocation2 + $0xf0] sm:$0xff] %v2351_v17   ;;  %2468 = vst [vmem:[#allocation2 + $0xf8] sm:$0xff] %v2356_v18  }
 0x28a PF: > { %p2062_p10 = scmp.ne.s32.totalorder %s3493_s13, 1 }
 0x28c   : > { %1585 = sbr.rel (%p2062_p10) target bundleno = 667 (0x29b), region = 48 }
 0x291   : > { %v2361_v22 = vpack.c.bf16 %v3090_v21, %v3086_v15  ;;  %v2366_v23 = vpack.c.bf16 %v3098_v42, %v3094_v27  ;;  %v2371_v25 = vpack.c.bf16 %v3106_v45, %v3102_v38  ;;  %v2376_v28 = vpack.c.bf16 %v3114_v57, %v3110_v51 }
 0x292   : > { %v2381_v30 = vpack.c.bf16 %v3088_v20, %v3084_v14  ;;  %v2386_v31 = vpack.c.bf16 %v3096_v32, %v3092_v26  ;;  %v2391_v34 = vpack.c.bf16 %v3104_v44, %v3100_v37  ;;  %v2396_v35 = vpack.c.bf16 %v3112_v56, %v3108_v50 }
 0x293   : > { %2362 = vst [vmem:[#allocation2] sm:$0xff] %v2361_v22   ;;  %2469 = vst [vmem:[#allocation2 + $0x8] sm:$0xff] %v2366_v23   ;;  %v2401_v39 = vpack.c.bf16 %v3118_v63, %v3116_v60  ;;  %v2406_v40 = vpack.c.bf16 %v3122_v5, %v3120_v2  ;;  %v2411_v43 = vpack.c.bf16 %v3126_v11, %v3124_v8 }
 0x294   : > { %2470 = vst [vmem:[#allocation2 + $0x10] sm:$0xff] %v2371_v25   ;;  %2471 = vst [vmem:[#allocation2 + $0x18] sm:$0xff] %v2376_v28   ;;  %v2416_v46 = vpack.c.bf16 %v3130_v19, %v3128_v16  ;;  %v2421_v48 = vpack.c.bf16 %v3134_v29, %v3132_v24  ;;  %v2426_v49 = vpack.c.bf16 %v3138_v36, %v3136_v33 }
 0x295   : > { %2472 = vst [vmem:[#allocation2 + $0x20] sm:$0xff] %v2381_v30   ;;  %2473 = vst [vmem:[#allocation2 + $0x28] sm:$0xff] %v2386_v31   ;;  %v2431_v53 = vpack.c.bf16 %v3142_v47, %v3140_v41  ;;  %v2436_v54 = vpack.c.bf16 %v3146_v55, %v3144_v52 }
 0x296   : > { %2474 = vst [vmem:[#allocation2 + $0x30] sm:$0xff] %v2391_v34   ;;  %2475 = vst [vmem:[#allocation2 + $0x38] sm:$0xff] %v2396_v35  }
 0x297   : > { %2476 = vst [vmem:[#allocation2 + $0x40] sm:$0xff] %v2401_v39   ;;  %2477 = vst [vmem:[#allocation2 + $0x48] sm:$0xff] %v2406_v40  }
 0x298   : > { %2478 = vst [vmem:[#allocation2 + $0x50] sm:$0xff] %v2411_v43   ;;  %2479 = vst [vmem:[#allocation2 + $0x58] sm:$0xff] %v2416_v46  }
 0x299   : > { %2480 = vst [vmem:[#allocation2 + $0x60] sm:$0xff] %v2421_v48   ;;  %2481 = vst [vmem:[#allocation2 + $0x68] sm:$0xff] %v2426_v49  }
 0x29a   : > { %2482 = vst [vmem:[#allocation2 + $0x70] sm:$0xff] %v2431_v53   ;;  %2483 = vst [vmem:[#allocation2 + $0x78] sm:$0xff] %v2436_v54  }
 0x29b PF: > { %p2095_p11 = scmp.ne.s32.totalorder %s2810_s15, 2 }
 0x29d   : > { %1737 = sbr.rel (%p2095_p11) target bundleno = 690 (0x2b2), region = 52 }
 0x2a2   : > { %1739 = vst [vmem:[%s3484_s3] sm:$0xff] %v3086_v15  ;;  %1740 = vst [vmem:[%s3484_s3 + $0x8] sm:$0xff] %v3090_v21 }
 0x2a3   : > { %1741 = vst [vmem:[%s3484_s3 + $0x10] sm:$0xff] %v3094_v27  ;;  %1742 = vst [vmem:[%s3484_s3 + $0x18] sm:$0xff] %v3098_v42 }
 0x2a4   : > { %1743 = vst [vmem:[%s3484_s3 + $0x20] sm:$0xff] %v3102_v38  ;;  %1744 = vst [vmem:[%s3484_s3 + $0x28] sm:$0xff] %v3106_v45 }
 0x2a5   : > { %1745 = vst [vmem:[%s3484_s3 + $0x30] sm:$0xff] %v3110_v51  ;;  %1746 = vst [vmem:[%s3484_s3 + $0x38] sm:$0xff] %v3114_v57 }
 0x2a6   : > { %1747 = vst [vmem:[%s3484_s3 + $0x40] sm:$0xff] %v3084_v14  ;;  %1748 = vst [vmem:[%s3484_s3 + $0x48] sm:$0xff] %v3088_v20 }
 0x2a7   : > { %1749 = vst [vmem:[%s3484_s3 + $0x50] sm:$0xff] %v3092_v26  ;;  %1750 = vst [vmem:[%s3484_s3 + $0x58] sm:$0xff] %v3096_v32 }
 0x2a8   : > { %1751 = vst [vmem:[%s3484_s3 + $0x60] sm:$0xff] %v3100_v37  ;;  %1752 = vst [vmem:[%s3484_s3 + $0x68] sm:$0xff] %v3104_v44 }
 0x2a9   : > { %1753 = vst [vmem:[%s3484_s3 + $0x70] sm:$0xff] %v3108_v50  ;;  %1754 = vst [vmem:[%s3484_s3 + $0x78] sm:$0xff] %v3112_v56 }
 0x2aa   : > { %1755 = vst [vmem:[%s3484_s3 + $0x80] sm:$0xff] %v3116_v60  ;;  %1756 = vst [vmem:[%s3484_s3 + $0x88] sm:$0xff] %v3118_v63 }
 0x2ab   : > { %1757 = vst [vmem:[%s3484_s3 + $0x90] sm:$0xff] %v3120_v2  ;;  %1758 = vst [vmem:[%s3484_s3 + $0x98] sm:$0xff] %v3122_v5 }
 0x2ac   : > { %1759 = vst [vmem:[%s3484_s3 + $0xa0] sm:$0xff] %v3124_v8  ;;  %1760 = vst [vmem:[%s3484_s3 + $0xa8] sm:$0xff] %v3126_v11 }
 0x2ad   : > { %1761 = vst [vmem:[%s3484_s3 + $0xb0] sm:$0xff] %v3128_v16  ;;  %1762 = vst [vmem:[%s3484_s3 + $0xb8] sm:$0xff] %v3130_v19 }
 0x2ae   : > { %1763 = vst [vmem:[%s3484_s3 + $0xc0] sm:$0xff] %v3132_v24  ;;  %1764 = vst [vmem:[%s3484_s3 + $0xc8] sm:$0xff] %v3134_v29 }
 0x2af   : > { %1765 = vst [vmem:[%s3484_s3 + $0xd0] sm:$0xff] %v3136_v33  ;;  %1766 = vst [vmem:[%s3484_s3 + $0xd8] sm:$0xff] %v3138_v36 }
 0x2b0   : > { %1767 = vst [vmem:[%s3484_s3 + $0xe0] sm:$0xff] %v3140_v41  ;;  %1768 = vst [vmem:[%s3484_s3 + $0xe8] sm:$0xff] %v3142_v47 }
 0x2b1   : > { %1769 = vst [vmem:[%s3484_s3 + $0xf0] sm:$0xff] %v3144_v52  ;;  %1770 = vst [vmem:[%s3484_s3 + $0xf8] sm:$0xff] %v3146_v55 }
 0x2b2 PF: > { %p2096_p12 = scmp.ne.s32.totalorder %s2810_s15, 5 }
 0x2b4   : > { %1774 = sbr.rel (%p2096_p12) target bundleno = 713 (0x2c9), region = 56 }
 0x2b9   : > { %1776 = vst [vmem:[%s3485_s4] sm:$0xff] %v3086_v15  ;;  %1777 = vst [vmem:[%s3485_s4 + $0x8] sm:$0xff] %v3090_v21 }
 0x2ba   : > { %1778 = vst [vmem:[%s3485_s4 + $0x10] sm:$0xff] %v3094_v27  ;;  %1779 = vst [vmem:[%s3485_s4 + $0x18] sm:$0xff] %v3098_v42 }
 0x2bb   : > { %1780 = vst [vmem:[%s3485_s4 + $0x20] sm:$0xff] %v3102_v38  ;;  %1781 = vst [vmem:[%s3485_s4 + $0x28] sm:$0xff] %v3106_v45 }
 0x2bc   : > { %1782 = vst [vmem:[%s3485_s4 + $0x30] sm:$0xff] %v3110_v51  ;;  %1783 = vst [vmem:[%s3485_s4 + $0x38] sm:$0xff] %v3114_v57 }
 0x2bd   : > { %1784 = vst [vmem:[%s3485_s4 + $0x40] sm:$0xff] %v3084_v14  ;;  %1785 = vst [vmem:[%s3485_s4 + $0x48] sm:$0xff] %v3088_v20 }
 0x2be   : > { %1786 = vst [vmem:[%s3485_s4 + $0x50] sm:$0xff] %v3092_v26  ;;  %1787 = vst [vmem:[%s3485_s4 + $0x58] sm:$0xff] %v3096_v32 }
 0x2bf   : > { %1788 = vst [vmem:[%s3485_s4 + $0x60] sm:$0xff] %v3100_v37  ;;  %1789 = vst [vmem:[%s3485_s4 + $0x68] sm:$0xff] %v3104_v44 }
 0x2c0   : > { %1790 = vst [vmem:[%s3485_s4 + $0x70] sm:$0xff] %v3108_v50  ;;  %1791 = vst [vmem:[%s3485_s4 + $0x78] sm:$0xff] %v3112_v56 }
 0x2c1   : > { %1792 = vst [vmem:[%s3485_s4 + $0x80] sm:$0xff] %v3116_v60  ;;  %1793 = vst [vmem:[%s3485_s4 + $0x88] sm:$0xff] %v3118_v63 }
 0x2c2   : > { %1794 = vst [vmem:[%s3485_s4 + $0x90] sm:$0xff] %v3120_v2  ;;  %1795 = vst [vmem:[%s3485_s4 + $0x98] sm:$0xff] %v3122_v5 }
 0x2c3   : > { %1796 = vst [vmem:[%s3485_s4 + $0xa0] sm:$0xff] %v3124_v8  ;;  %1797 = vst [vmem:[%s3485_s4 + $0xa8] sm:$0xff] %v3126_v11 }
 0x2c4   : > { %1798 = vst [vmem:[%s3485_s4 + $0xb0] sm:$0xff] %v3128_v16  ;;  %1799 = vst [vmem:[%s3485_s4 + $0xb8] sm:$0xff] %v3130_v19 }
 0x2c5   : > { %1800 = vst [vmem:[%s3485_s4 + $0xc0] sm:$0xff] %v3132_v24  ;;  %1801 = vst [vmem:[%s3485_s4 + $0xc8] sm:$0xff] %v3134_v29 }
 0x2c6   : > { %1802 = vst [vmem:[%s3485_s4 + $0xd0] sm:$0xff] %v3136_v33  ;;  %1803 = vst [vmem:[%s3485_s4 + $0xd8] sm:$0xff] %v3138_v36 }
 0x2c7   : > { %1804 = vst [vmem:[%s3485_s4 + $0xe0] sm:$0xff] %v3140_v41  ;;  %1805 = vst [vmem:[%s3485_s4 + $0xe8] sm:$0xff] %v3142_v47 }
 0x2c8   : > { %1806 = vst [vmem:[%s3485_s4 + $0xf0] sm:$0xff] %v3144_v52  ;;  %1807 = vst [vmem:[%s3485_s4 + $0xf8] sm:$0xff] %v3146_v55 }
 0x2c9 PF: > { %s15_s17 = sadd.s32 1, %s2818_s17   ;;  %s3486_s15 = smov %s2814_s16 }
 0x2ca   : > { %p12_p13 = scmp.ge.s32.totalorder %s15_s17, 8   ;;  %s3487_s16 = smov %s3489_s18 }
 0x2cc   :  { %14 = sbr.rel (!%p12_p13) target bundleno = 2 (0x2), region = 98 }

</bundles_post_ra>
